<compile_context>
chip_gen: v5e
topology: v5e:2x2
jax: 0.10.0
libtpu: 0.0.40
codegen_flags: <defaults>
</compile_context>

<pallas_src>
import jax
import jax.numpy as jnp
import numpy as np
from jax import lax
from jax.experimental import pallas as pl
from jax.experimental.pallas import tpu as pltpu

HIGHEST = lax.Precision.HIGHEST
_VMEM_LIMIT = 48 * 1024 * 1024       # v7x-safe (64 MiB physical); ample on v5e/v6e.


def _round_up(x, m):
    return ((x + m - 1) // m) * m


def _pinned(arr):
    """BlockSpec that keeps a small weight/bias resident across all grid steps."""
    nd = arr.ndim
    return pl.BlockSpec(arr.shape, lambda *_: (0,) * nd)


def _bf16(x):
    return x.astype(jnp.bfloat16)


def _dot(a, b):
    # f32 HIGHEST matmul -- used only by the pure-JAX reference.
    return jnp.dot(a, b, precision=HIGHEST, preferred_element_type=jnp.float32)


# ---------------------------------------------------------------------------
# Kernel 1: embedding projection + 2-layer highway encoder (gridded over rows).
# layout: emb block is (row_blk, E); weights pre-cast to bf16, pinned;
#         biases f32 (1, H). Matmuls are bf16-in / f32-accumulate.
# ---------------------------------------------------------------------------
def emb_hwy_kernel(emb_ref, wp_ref,
                   wt0_ref, bt0_ref, wg0_ref, bg0_ref,
                   wt1_ref, bt1_ref, wg1_ref, bg1_ref,
                   o_ref):
    x = emb_ref[...].astype(jnp.bfloat16)
    h = jnp.dot(x, wp_ref[...], preferred_element_type=jnp.float32)  # projection
    for wt, bt, wg, bg in ((wt0_ref, bt0_ref, wg0_ref, bg0_ref),
                           (wt1_ref, bt1_ref, wg1_ref, bg1_ref)):
        hb = h.astype(jnp.bfloat16)
        g = jax.nn.sigmoid(jnp.dot(hb, wg[...], preferred_element_type=jnp.float32)
                           + bg[...])
        t = jax.nn.relu(jnp.dot(hb, wt[...], preferred_element_type=jnp.float32)
                        + bt[...])
        h = g * t + (1.0 - g) * h
    o_ref[...] = h


def emb_hwy_pallas(emb_flat, p, row_block=256):
    N, E = emb_flat.shape
    H = p['wp'].shape[1]
    blk = min(row_block, _round_up(N, 8))
    Np = _round_up(N, blk)
    if Np != N:
        emb_flat = jnp.pad(emb_flat, ((0, Np - N), (0, 0)))

    wp = _bf16(p['wp'])
    wt0, wg0 = _bf16(p['wt0']), _bf16(p['wg0'])
    wt1, wg1 = _bf16(p['wt1']), _bf16(p['wg1'])
    bt0, bg0, bt1, bg1 = p['bt0'], p['bg0'], p['bt1'], p['bg1']

    out = pl.pallas_call(
        emb_hwy_kernel,
        out_shape=jax.ShapeDtypeStruct((Np, H), jnp.float32),
        grid=(Np // blk,),
        in_specs=[pl.BlockSpec((blk, E), lambda i: (i, 0)),
                  _pinned(wp),
                  _pinned(wt0), _pinned(bt0), _pinned(wg0), _pinned(bg0),
                  _pinned(wt1), _pinned(bt1), _pinned(wg1), _pinned(bg1)],
        out_specs=pl.BlockSpec((blk, H), lambda i: (i, 0)),
        compiler_params=pltpu.CompilerParams(
            dimension_semantics=("parallel",),
            vmem_limit_bytes=_VMEM_LIMIT),
    )(emb_flat, wp, wt0, bt0, wg0, bg0, wt1, bt1, wg1, bg1)
    return out[:N]


# ---------------------------------------------------------------------------
# Kernel 2: bidirectional LSTM, gridded over batch blocks ("parallel" axis).
# layout: x block (L, bb, H) time-major; lens (bb, 1) int32;
#         wih = [Wih_f | Wih_b] (H, 8H) bf16; whh_f/whh_b (H, 4H) bf16;
#         b = [b_ih_f+b_hh_f | b_ih_b+b_hh_b] (1, 8H) f32;
#         gate order is PyTorch [i, f, g, o].
# ---------------------------------------------------------------------------
def bilstm_kernel(x_ref, len_ref, wih_ref, whh_f_ref, whh_b_ref, b_ref,
                  out_ref, gin_ref, mask_ref, outf_ref, outb_ref):
    L, Bb, Hin = x_ref.shape
    G4 = whh_f_ref.shape[1]              # 4*H
    Hh = G4 // 4                         # hidden size

    # Hoisted input projection for BOTH directions: one big MXU matmul (+bias).
    x_flat = x_ref[...].reshape(L * Bb, Hin).astype(jnp.bfloat16)
    gin = jnp.dot(x_flat, wih_ref[...], preferred_element_type=jnp.float32) + b_ref[...]
    gin_ref[...] = gin.reshape(L, Bb, 2 * G4)

    # Hoisted per-timestep validity mask: one vectorized compare for all (t, b).
    t_iota = lax.broadcasted_iota(jnp.int32, (L, Bb, Hh), 0)
    mask_ref[...] = (t_iota < len_ref[...]).astype(jnp.float32)

    whh_f = whh_f_ref[...]               # bf16, loaded once outside the loop
    whh_b = whh_b_ref[...]

    def cell(gates, c):
        i = jax.nn.sigmoid(gates[:, 0:Hh])
        f = jax.nn.sigmoid(gates[:, Hh:2 * Hh])
        g = jnp.tanh(gates[:, 2 * Hh:3 * Hh])
        o = jax.nn.sigmoid(gates[:, 3 * Hh:4 * Hh])
        c_new = f * c + i * g
        return o * jnp.tanh(c_new), c_new

    def body(s, carry):
        hf, cf, hb, cb = carry
        tb = L - 1 - s
        # Only the recurrent h @ Whh matmuls remain on the serial path.
        gf = gin_ref[s][:, 0:G4] + jnp.dot(
            hf.astype(jnp.bfloat16), whh_f, preferred_element_type=jnp.float32)
        gb = gin_ref[tb][:, G4:2 * G4] + jnp.dot(
            hb.astype(jnp.bfloat16), whh_b, preferred_element_type=jnp.float32)
        hf_n, cf_n = cell(gf, cf)
        hb_n, cb_n = cell(gb, cb)
        mf = mask_ref[s]
        mb = mask_ref[tb]
        hf = mf * hf_n + (1.0 - mf) * hf
        cf = mf * cf_n + (1.0 - mf) * cf
        hb = mb * hb_n + (1.0 - mb) * hb
        cb = mb * cb_n + (1.0 - mb) * cb
        outf_ref[s] = mf * hf            # padded positions -> 0
        outb_ref[tb] = mb * hb
        return hf, cf, hb, cb

    zero = jnp.zeros((Bb, Hh), jnp.float32)
    lax.fori_loop(0, L, body, (zero, zero, zero, zero))

    # Assemble the single (L, Bb, 2H) output with two static stores (no host concat).
    out_ref[:, :, 0:Hh] = outf_ref[...]
    out_ref[:, :, Hh:2 * Hh] = outb_ref[...]


def bilstm_pallas(x, lengths, p, batch_block=8):
    # x: (B, L, H) batch-first; the recurrence runs time-major inside the kernel.
    # TODO(synk): the time-major transpose in/out is still done by XLA; reading
    # batch-first per-timestep in-kernel would need strided loads of x per step.
    B, L, H = x.shape
    if B <= batch_block:
        bb, Bp = B, B
    else:
        bb, Bp = batch_block, _round_up(B, batch_block)
    if Bp != B:
        x = jnp.pad(x, ((0, Bp - B), (0, 0), (0, 0)))
        lengths = jnp.pad(lengths, (0, Bp - B))

    xt = jnp.transpose(x, (1, 0, 2))                    # (L, Bp, H)
    lens = lengths.reshape(Bp, 1).astype(jnp.int32)

    G4 = p['whh_f'].shape[1]
    Hh = G4 // 4
    wih = _bf16(jnp.concatenate([p['wih_f'], p['wih_b']], axis=1))   # (H, 8H)
    b = jnp.concatenate([p['b_f'], p['b_b']], axis=1)                # (1, 8H) f32
    whh_f = _bf16(p['whh_f'])
    whh_b = _bf16(p['whh_b'])

    out = pl.pallas_call(
        bilstm_kernel,
        out_shape=jax.ShapeDtypeStruct((L, Bp, 2 * Hh), jnp.float32),
        grid=(Bp // bb,),
        in_specs=[pl.BlockSpec((L, bb, H), lambda i: (0, i, 0)),
                  pl.BlockSpec((bb, 1), lambda i: (i, 0)),
                  _pinned(wih), _pinned(whh_f), _pinned(whh_b), _pinned(b)],
        out_specs=pl.BlockSpec((L, bb, 2 * Hh), lambda i: (0, i, 0)),
        scratch_shapes=[pltpu.VMEM((L, bb, 2 * G4), jnp.float32),  # input gates
                        pltpu.VMEM((L, bb, Hh), jnp.float32),      # validity mask
                        pltpu.VMEM((L, bb, Hh), jnp.float32),      # fwd outputs
                        pltpu.VMEM((L, bb, Hh), jnp.float32)],     # bwd outputs
        compiler_params=pltpu.CompilerParams(
            dimension_semantics=("parallel",),
            vmem_limit_bytes=_VMEM_LIMIT),
    )(xt, lens, wih, whh_f, whh_b, b)

    out = jnp.transpose(out, (1, 0, 2))                 # (Bp, L, 2H)
    return out[:B]


# ---------------------------------------------------------------------------
# Kernel 3: LinearOutput -- two Linear(2H->1) heads + masked log-softmax.
# Gridded over batch; enc is read once and shared by both heads; math stays f32.
# ---------------------------------------------------------------------------
def linear_out_kernel(enc_ref, mask_ref, w1_ref, b1_ref, w2_ref, b2_ref,
                      o1_ref, o2_ref):
    enc = enc_ref[...]                   # (bb, T, 2H), single read for both heads
    mask = mask_ref[...]                 # (bb, T)

    def head(w, b):
        logits = jnp.sum(enc * w, axis=-1) + b            # (bb, T)
        ml = mask * logits + (1.0 - mask) * (-1e30)       # keep this in f32
        m = jnp.max(ml, axis=-1, keepdims=True)
        lse = jnp.log(jnp.sum(jnp.exp(ml - m), axis=-1, keepdims=True))
        return ml - m - lse

    o1_ref[...] = head(w1_ref[...], b1_ref[...])
    o2_ref[...] = head(w2_ref[...], b2_ref[...])


def linear_output_pallas(enc, mask_f32, p, batch_block=8):
    B, T, H2 = enc.shape
    if B <= batch_block:
        bb, Bp = B, B
    else:
        bb, Bp = batch_block, _round_up(B, batch_block)
    if Bp != B:
        enc = jnp.pad(enc, ((0, Bp - B), (0, 0), (0, 0)))
        mask_f32 = jnp.pad(mask_f32, ((0, Bp - B), (0, 0)))

    o1, o2 = pl.pallas_call(
        linear_out_kernel,
        out_shape=(jax.ShapeDtypeStruct((Bp, T), jnp.float32),
                   jax.ShapeDtypeStruct((Bp, T), jnp.float32)),
        grid=(Bp // bb,),
        in_specs=[pl.BlockSpec((bb, T, H2), lambda i: (i, 0, 0)),
                  pl.BlockSpec((bb, T), lambda i: (i, 0)),
                  _pinned(p['w1']), _pinned(p['b1']),
                  _pinned(p['w2']), _pinned(p['b2'])],
        out_specs=(pl.BlockSpec((bb, T), lambda i: (i, 0)),
                   pl.BlockSpec((bb, T), lambda i: (i, 0))),
        compiler_params=pltpu.CompilerParams(
            dimension_semantics=("parallel",),
            vmem_limit_bytes=_VMEM_LIMIT),
    )(enc, mask_f32, p['w1'], p['b1'], p['w2'], p['b2'])
    return o1[:B], o2[:B]


# ---------------------------------------------------------------------------
# Full forward (Pallas-backed)
# ---------------------------------------------------------------------------
def forward(p, cw_idxs, qw_idxs):
    c_mask = (cw_idxs != 0)
    q_mask = (qw_idxs != 0)
    c_len = c_mask.sum(-1).astype(jnp.int32)
    q_len = q_mask.sum(-1).astype(jnp.int32)

    B, Lc = cw_idxs.shape
    _, Lq = qw_idxs.shape
    E = p['wv'].shape[1]
    H = p['wp'].shape[1]

    # Embedding gather (XLA glue) + ONE fused projection/highway call for c and q.
    c_e = jnp.take(p['wv'], cw_idxs, axis=0).reshape(B * Lc, E)
    q_e = jnp.take(p['wv'], qw_idxs, axis=0).reshape(B * Lq, E)
    hwy = emb_hwy_pallas(jnp.concatenate([c_e, q_e], axis=0), p)    # (B*(Lc+Lq), H)
    c_emb = hwy[:B * Lc].reshape(B, Lc, H)
    q_emb = hwy[B * Lc:].reshape(B, Lq, H)

    # ONE bidirectional LSTM call over the stacked (context, question) batch.
    Lmax = max(Lc, Lq)
    c_pad = jnp.pad(c_emb, ((0, 0), (0, Lmax - Lc), (0, 0))) if Lc < Lmax else c_emb
    q_pad = jnp.pad(q_emb, ((0, 0), (0, Lmax - Lq), (0, 0))) if Lq < Lmax else q_emb
    x_stack = jnp.concatenate([c_pad, q_pad], axis=0)               # (2B, Lmax, H)
    len_stack = jnp.concatenate([c_len, q_len], axis=0)             # (2B,)
    enc_stack = bilstm_pallas(x_stack, len_stack, p)                # (2B, Lmax, 2H)
    c_enc = enc_stack[:B, :Lc]
    q_enc = enc_stack[B:, :Lq]

    # Output heads on the concatenated sequence.
    concat_enc = jnp.concatenate([c_enc, q_enc], axis=1)            # (B, Lc+Lq, 2H)
    concat_mask = jnp.concatenate([c_mask, q_mask], axis=1).astype(jnp.float32)
    out1, out2 = linear_output_pallas(concat_enc, concat_mask, p)
    return out1[:, :Lc], out2[:, :Lc]


# ---------------------------------------------------------------------------
# Pure-JAX reference (f32, HIGHEST precision) for verification
# ---------------------------------------------------------------------------
def _lstm_dir_ref(x, lens, wih, whh, b, reverse):
    B, L, H = x.shape
    h0 = jnp.zeros((B, H), jnp.float32)
    c0 = jnp.zeros((B, H), jnp.float32)

    def body(carry, t):
        h, c = carry
        xt = x[:, t, :]
        gates = _dot(xt, wih) + _dot(h, whh) + b
        i = jax.nn.sigmoid(gates[:, 0 * H:1 * H])
        f = jax.nn.sigmoid(gates[:, 1 * H:2 * H])
        g = jnp.tanh(gates[:, 2 * H:3 * H])
        o = jax.nn.sigmoid(gates[:, 3 * H:4 * H])
        c_new = f * c + i * g
        h_new = o * jnp.tanh(c_new)
        m = (t < lens)[:, None].astype(jnp.float32)
        h = m * h_new + (1.0 - m) * h
        c = m * c_new + (1.0 - m) * c
        return (h, c), m * h

    ts = jnp.arange(L - 1, -1, -1) if reverse else jnp.arange(L)
    _, outs = lax.scan(body, (h0, c0), ts)
    if reverse:
        outs = outs[::-1]
    return jnp.transpose(outs, (1, 0, 2))


def reference_forward(p, cw_idxs, qw_idxs):
    c_mask = (cw_idxs != 0)
    q_mask = (qw_idxs != 0)
    c_len = c_mask.sum(-1).astype(jnp.int32)
    q_len = q_mask.sum(-1).astype(jnp.int32)

    def embed(idxs):
        emb = jnp.take(p['wv'], idxs, axis=0)
        h = _dot(emb, p['wp'])
        for wt, bt, wg, bg in (('wt0', 'bt0', 'wg0', 'bg0'),
                               ('wt1', 'bt1', 'wg1', 'bg1')):
            g = jax.nn.sigmoid(_dot(h, p[wg]) + p[bg])
            t = jax.nn.relu(_dot(h, p[wt]) + p[bt])
            h = g * t + (1.0 - g) * h
        return h

    def enc(x, lens):
        of = _lstm_dir_ref(x, lens, p['wih_f'], p['whh_f'], p['b_f'], False)
        ob = _lstm_dir_ref(x, lens, p['wih_b'], p['whh_b'], p['b_b'], True)
        return jnp.concatenate([of, ob], axis=-1)

    c_enc = enc(embed(cw_idxs), c_len)
    q_enc = enc(embed(qw_idxs), q_len)
    concat_enc = jnp.concatenate([c_enc, q_enc], axis=1)
    concat_mask = jnp.concatenate([c_mask, q_mask], axis=1).astype(jnp.float32)

    def head(w, b):
        logits = jnp.sum(concat_enc * w, axis=-1) + b
        ml = concat_mask * logits + (1.0 - concat_mask) * (-1e30)
        return jax.nn.log_softmax(ml, axis=-1)

    o1 = head(p['w1'], p['b1'])
    o2 = head(p['w2'], p['b2'])
    lc = c_enc.shape[1]
    return o1[:, :lc], o2[:, :lc]


# ---------------------------------------------------------------------------
# Deterministic parameter init
# ---------------------------------------------------------------------------
def init_params(key, V, E, H):
    ks = jax.random.split(key, 20)

    def nrm(k, shape, scale=0.1):
        return (scale * jax.random.normal(k, shape)).astype(jnp.float32)

    return dict(
        wv=nrm(ks[0], (V, E), 1.0),
        wp=nrm(ks[1], (E, H)),
        wt0=nrm(ks[2], (H, H)), bt0=nrm(ks[3], (1, H)),
        wg0=nrm(ks[4], (H, H)), bg0=nrm(ks[5], (1, H)),
        wt1=nrm(ks[6], (H, H)), bt1=nrm(ks[7], (1, H)),
        wg1=nrm(ks[8], (H, H)), bg1=nrm(ks[9], (1, H)),
        wih_f=nrm(ks[10], (H, 4 * H)), whh_f=nrm(ks[11], (H, 4 * H)),
        b_f=nrm(ks[12], (1, 4 * H)),
        wih_b=nrm(ks[13], (H, 4 * H)), whh_b=nrm(ks[14], (H, 4 * H)),
        b_b=nrm(ks[15], (1, 4 * H)),
        w1=nrm(ks[16], (1, 1, 2 * H)), b1=nrm(ks[17], (1, 1)),
        w2=nrm(ks[18], (1, 1, 2 * H)), b2=nrm(ks[19], (1, 1)),
    )


if __name__ == "__main__":
    V, E, H = 50, 64, 32           # vocab, embed dim, hidden size
    B, Lc, Lq = 2, 16, 8           # batch, context len, question len

    key = jax.random.PRNGKey(0)
    kp, kc, kq = jax.random.split(key, 3)
    params = init_params(kp, V, E, H)

    # Word indices (0 = padding, trailing), as the SQuAD data pipeline produces.
    cw = jax.random.randint(kc, (B, Lc), 1, V, dtype=jnp.int32)
    qw = jax.random.randint(kq, (B, Lq), 1, V, dtype=jnp.int32)
    c_lens = jnp.array([Lc, 12], dtype=jnp.int32)
    q_lens = jnp.array([Lq, 5], dtype=jnp.int32)
    cw = jnp.where(jnp.arange(Lc)[None, :] < c_lens[:, None], cw, 0)
    qw = jnp.where(jnp.arange(Lq)[None, :] < q_lens[:, None], qw, 0)

    out1, out2 = jax.jit(forward)(params, cw, qw)
    jax.block_until_ready((out1, out2))

    ref1, ref2 = reference_forward(params, cw, qw)
    assert out1.shape == (B, Lc) and out2.shape == (B, Lc)
    # Tolerance accounts for bf16-in / f32-accumulate matmuls in the kernels
    # vs. the f32 HIGHEST reference.
    np.testing.assert_allclose(np.asarray(out1), np.asarray(ref1), atol=2e-2, rtol=2e-2)
    np.testing.assert_allclose(np.asarray(out2), np.asarray(ref2), atol=2e-2, rtol=2e-2)

    # TODO(synk): dropout is identity (drop_prob=0 / eval mode), so it is omitted.
    print("KERNEL_OK")
</pallas_src>

<mosaic_0001>
module attributes {stable_mosaic.version = 11 : i64} {
  func.func @emb_hwy_kernel(%arg0: i32, %arg1: memref<48x64xf32, #tpu.memory_space<vmem>>, %arg2: memref<64x32xbf16, #tpu.memory_space<vmem>>, %arg3: memref<32x32xbf16, #tpu.memory_space<vmem>>, %arg4: memref<1x32xf32, #tpu.memory_space<vmem>>, %arg5: memref<32x32xbf16, #tpu.memory_space<vmem>>, %arg6: memref<1x32xf32, #tpu.memory_space<vmem>>, %arg7: memref<32x32xbf16, #tpu.memory_space<vmem>>, %arg8: memref<1x32xf32, #tpu.memory_space<vmem>>, %arg9: memref<32x32xbf16, #tpu.memory_space<vmem>>, %arg10: memref<1x32xf32, #tpu.memory_space<vmem>>, %arg11: memref<48x32xf32, #tpu.memory_space<vmem>>) attributes {dimension_semantics = [#tpu.dimension_semantics<parallel>], iteration_bounds = array<i64: 1>, scalar_prefetch = 0 : i64, scratch_operands = 0 : i64, tpu.core_type = #tpu.core_type<tc>, window_params = [{transform_indices = @transform_0, window_bounds = array<i64: 48, 64>}, {pipeline_mode = #tpu.pipeline_mode<synchronous>, transform_indices = @transform_1, window_bounds = array<i64: 64, 32>}, {pipeline_mode = #tpu.pipeline_mode<synchronous>, transform_indices = @transform_2, window_bounds = array<i64: 32, 32>}, {pipeline_mode = #tpu.pipeline_mode<synchronous>, transform_indices = @transform_3, window_bounds = array<i64: 1, 32>}, {pipeline_mode = #tpu.pipeline_mode<synchronous>, transform_indices = @transform_4, window_bounds = array<i64: 32, 32>}, {pipeline_mode = #tpu.pipeline_mode<synchronous>, transform_indices = @transform_5, window_bounds = array<i64: 1, 32>}, {pipeline_mode = #tpu.pipeline_mode<synchronous>, transform_indices = @transform_6, window_bounds = array<i64: 32, 32>}, {pipeline_mode = #tpu.pipeline_mode<synchronous>, transform_indices = @transform_7, window_bounds = array<i64: 1, 32>}, {pipeline_mode = #tpu.pipeline_mode<synchronous>, transform_indices = @transform_8, window_bounds = array<i64: 32, 32>}, {pipeline_mode = #tpu.pipeline_mode<synchronous>, transform_indices = @transform_9, window_bounds = array<i64: 1, 32>}, {transform_indices = @transform_10, window_bounds = array<i64: 48, 32>}]} {
    %c0 = arith.constant 0 : index
    %c0_0 = arith.constant 0 : index
    %0 = vector.load %arg1[%c0, %c0_0] : memref<48x64xf32, #tpu.memory_space<vmem>>, vector<48x64xf32>
    %1 = arith.truncf %0 : vector<48x64xf32> to vector<48x64xbf16>
    %c0_1 = arith.constant 0 : index
    %c0_2 = arith.constant 0 : index
    %2 = vector.load %arg2[%c0_1, %c0_2] : memref<64x32xbf16, #tpu.memory_space<vmem>>, vector<64x32xbf16>
    %cst = arith.constant dense<0.000000e+00> : vector<48x32xf32>
    %3 = tpu.matmul %1, %2, %cst {dimension_numbers = #tpu.dot_dimension_numbers<[1], [0], [0], [1], [0, 0, 1, 1], [], []>} : vector<48x64xbf16>, vector<64x32xbf16>, vector<48x32xf32> -> vector<48x32xf32>
    %4 = arith.truncf %3 : vector<48x32xf32> to vector<48x32xbf16>
    %c0_3 = arith.constant 0 : index
    %c0_4 = arith.constant 0 : index
    %5 = vector.load %arg5[%c0_3, %c0_4] : memref<32x32xbf16, #tpu.memory_space<vmem>>, vector<32x32xbf16>
    %cst_5 = arith.constant dense<0.000000e+00> : vector<48x32xf32>
    %6 = tpu.matmul %4, %5, %cst_5 {dimension_numbers = #tpu.dot_dimension_numbers<[1], [0], [0], [1], [0, 0, 1, 1], [], []>} : vector<48x32xbf16>, vector<32x32xbf16>, vector<48x32xf32> -> vector<48x32xf32>
    %c0_6 = arith.constant 0 : index
    %c0_7 = arith.constant 0 : index
    %7 = vector.load %arg6[%c0_6, %c0_7] : memref<1x32xf32, #tpu.memory_space<vmem>>, vector<1x32xf32>
    %8 = vector.broadcast %7 : vector<1x32xf32> to vector<48x32xf32>
    %9 = arith.addf %6, %8 : vector<48x32xf32>
    %10 = arith.negf %9 : vector<48x32xf32>
    %11 = math.exp %10 : vector<48x32xf32>
    %cst_8 = arith.constant 1.000000e+00 : f32
    %12 = vector.broadcast %cst_8 : f32 to vector<48x32xf32>
    %13 = arith.addf %12, %11 : vector<48x32xf32>
    %14 = arith.divf %12, %13 : vector<48x32xf32>
    %c0_9 = arith.constant 0 : index
    %c0_10 = arith.constant 0 : index
    %15 = vector.load %arg3[%c0_9, %c0_10] : memref<32x32xbf16, #tpu.memory_space<vmem>>, vector<32x32xbf16>
    %cst_11 = arith.constant dense<0.000000e+00> : vector<48x32xf32>
    %16 = tpu.matmul %4, %15, %cst_11 {dimension_numbers = #tpu.dot_dimension_numbers<[1], [0], [0], [1], [0, 0, 1, 1], [], []>} : vector<48x32xbf16>, vector<32x32xbf16>, vector<48x32xf32> -> vector<48x32xf32>
    %c0_12 = arith.constant 0 : index
    %c0_13 = arith.constant 0 : index
    %17 = vector.load %arg4[%c0_12, %c0_13] : memref<1x32xf32, #tpu.memory_space<vmem>>, vector<1x32xf32>
    %18 = vector.broadcast %17 : vector<1x32xf32> to vector<48x32xf32>
    %19 = arith.addf %16, %18 : vector<48x32xf32>
    %cst_14 = arith.constant 0.000000e+00 : f32
    %20 = vector.broadcast %cst_14 : f32 to vector<48x32xf32>
    %21 = arith.maximumf %19, %20 : vector<48x32xf32>
    %22 = arith.mulf %14, %21 : vector<48x32xf32>
    %cst_15 = arith.constant 1.000000e+00 : f32
    %23 = vector.broadcast %cst_15 : f32 to vector<48x32xf32>
    %24 = arith.subf %23, %14 : vector<48x32xf32>
    %25 = arith.mulf %24, %3 : vector<48x32xf32>
    %26 = arith.addf %22, %25 : vector<48x32xf32>
    %27 = arith.truncf %26 : vector<48x32xf32> to vector<48x32xbf16>
    %c0_16 = arith.constant 0 : index
    %c0_17 = arith.constant 0 : index
    %28 = vector.load %arg9[%c0_16, %c0_17] : memref<32x32xbf16, #tpu.memory_space<vmem>>, vector<32x32xbf16>
    %cst_18 = arith.constant dense<0.000000e+00> : vector<48x32xf32>
    %29 = tpu.matmul %27, %28, %cst_18 {dimension_numbers = #tpu.dot_dimension_numbers<[1], [0], [0], [1], [0, 0, 1, 1], [], []>} : vector<48x32xbf16>, vector<32x32xbf16>, vector<48x32xf32> -> vector<48x32xf32>
    %c0_19 = arith.constant 0 : index
    %c0_20 = arith.constant 0 : index
    %30 = vector.load %arg10[%c0_19, %c0_20] : memref<1x32xf32, #tpu.memory_space<vmem>>, vector<1x32xf32>
    %31 = vector.broadcast %30 : vector<1x32xf32> to vector<48x32xf32>
    %32 = arith.addf %29, %31 : vector<48x32xf32>
    %33 = arith.negf %32 : vector<48x32xf32>
    %34 = math.exp %33 : vector<48x32xf32>
    %cst_21 = arith.constant 1.000000e+00 : f32
    %35 = vector.broadcast %cst_21 : f32 to vector<48x32xf32>
    %36 = arith.addf %35, %34 : vector<48x32xf32>
    %37 = arith.divf %35, %36 : vector<48x32xf32>
    %c0_22 = arith.constant 0 : index
    %c0_23 = arith.constant 0 : index
    %38 = vector.load %arg7[%c0_22, %c0_23] : memref<32x32xbf16, #tpu.memory_space<vmem>>, vector<32x32xbf16>
    %cst_24 = arith.constant dense<0.000000e+00> : vector<48x32xf32>
    %39 = tpu.matmul %27, %38, %cst_24 {dimension_numbers = #tpu.dot_dimension_numbers<[1], [0], [0], [1], [0, 0, 1, 1], [], []>} : vector<48x32xbf16>, vector<32x32xbf16>, vector<48x32xf32> -> vector<48x32xf32>
    %c0_25 = arith.constant 0 : index
    %c0_26 = arith.constant 0 : index
    %40 = vector.load %arg8[%c0_25, %c0_26] : memref<1x32xf32, #tpu.memory_space<vmem>>, vector<1x32xf32>
    %41 = vector.broadcast %40 : vector<1x32xf32> to vector<48x32xf32>
    %42 = arith.addf %39, %41 : vector<48x32xf32>
    %cst_27 = arith.constant 0.000000e+00 : f32
    %43 = vector.broadcast %cst_27 : f32 to vector<48x32xf32>
    %44 = arith.maximumf %42, %43 : vector<48x32xf32>
    %45 = arith.mulf %37, %44 : vector<48x32xf32>
    %cst_28 = arith.constant 1.000000e+00 : f32
    %46 = vector.broadcast %cst_28 : f32 to vector<48x32xf32>
    %47 = arith.subf %46, %37 : vector<48x32xf32>
    %48 = arith.mulf %47, %26 : vector<48x32xf32>
    %49 = arith.addf %45, %48 : vector<48x32xf32>
    %c0_29 = arith.constant 0 : index
    %c0_30 = arith.constant 0 : index
    %50 = vector.load %arg11[%c0_29, %c0_30] : memref<48x32xf32, #tpu.memory_space<vmem>>, vector<48x32xf32>
    tpu.vector_store %arg11[%c0_29, %c0_30], %49 {strides = array<i32>} : memref<48x32xf32, #tpu.memory_space<vmem>>, vector<48x32xf32>,
    return
  }
  func.func @transform_0(%arg0: i32) -> (i32, i32) {
    %c0_i32 = arith.constant 0 : i32
    %c0_i32_0 = arith.constant 0 : i32
    return %arg0, %c0_i32 : i32, i32
  }
  func.func @transform_1(%arg0: i32) -> (i32, i32) {
    %c0_i32 = arith.constant 0 : i32
    %c0_i32_0 = arith.constant 0 : i32
    %c0_i32_1 = arith.constant 0 : i32
    return %c0_i32, %c0_i32_0 : i32, i32
  }
  func.func @transform_2(%arg0: i32) -> (i32, i32) {
    %c0_i32 = arith.constant 0 : i32
    %c0_i32_0 = arith.constant 0 : i32
    %c0_i32_1 = arith.constant 0 : i32
    return %c0_i32, %c0_i32_0 : i32, i32
  }
  func.func @transform_3(%arg0: i32) -> (i32, i32) {
    %c0_i32 = arith.constant 0 : i32
    %c0_i32_0 = arith.constant 0 : i32
    %c0_i32_1 = arith.constant 0 : i32
    return %c0_i32, %c0_i32_0 : i32, i32
  }
  func.func @transform_4(%arg0: i32) -> (i32, i32) {
    %c0_i32 = arith.constant 0 : i32
    %c0_i32_0 = arith.constant 0 : i32
    %c0_i32_1 = arith.constant 0 : i32
    return %c0_i32, %c0_i32_0 : i32, i32
  }
  func.func @transform_5(%arg0: i32) -> (i32, i32) {
    %c0_i32 = arith.constant 0 : i32
    %c0_i32_0 = arith.constant 0 : i32
    %c0_i32_1 = arith.constant 0 : i32
    return %c0_i32, %c0_i32_0 : i32, i32
  }
  func.func @transform_6(%arg0: i32) -> (i32, i32) {
    %c0_i32 = arith.constant 0 : i32
    %c0_i32_0 = arith.constant 0 : i32
    %c0_i32_1 = arith.constant 0 : i32
    return %c0_i32, %c0_i32_0 : i32, i32
  }
  func.func @transform_7(%arg0: i32) -> (i32, i32) {
    %c0_i32 = arith.constant 0 : i32
    %c0_i32_0 = arith.constant 0 : i32
    %c0_i32_1 = arith.constant 0 : i32
    return %c0_i32, %c0_i32_0 : i32, i32
  }
  func.func @transform_8(%arg0: i32) -> (i32, i32) {
    %c0_i32 = arith.constant 0 : i32
    %c0_i32_0 = arith.constant 0 : i32
    %c0_i32_1 = arith.constant 0 : i32
    return %c0_i32, %c0_i32_0 : i32, i32
  }
  func.func @transform_9(%arg0: i32) -> (i32, i32) {
    %c0_i32 = arith.constant 0 : i32
    %c0_i32_0 = arith.constant 0 : i32
    %c0_i32_1 = arith.constant 0 : i32
    return %c0_i32, %c0_i32_0 : i32, i32
  }
  func.func @transform_10(%arg0: i32) -> (i32, i32) {
    %c0_i32 = arith.constant 0 : i32
    %c0_i32_0 = arith.constant 0 : i32
    return %arg0, %c0_i32 : i32, i32
  }
}

module attributes {stable_mosaic.version = 11 : i64} {
  func.func @bilstm_kernel(%arg0: i32, %arg1: memref<16x4x32xf32, #tpu.memory_space<vmem>>, %arg2: memref<4x1xi32, #tpu.memory_space<vmem>>, %arg3: memref<32x256xbf16, #tpu.memory_space<vmem>>, %arg4: memref<32x128xbf16, #tpu.memory_space<vmem>>, %arg5: memref<32x128xbf16, #tpu.memory_space<vmem>>, %arg6: memref<1x256xf32, #tpu.memory_space<vmem>>, %arg7: memref<16x4x64xf32, #tpu.memory_space<vmem>>, %arg8: memref<16x4x256xf32, #tpu.memory_space<vmem>>, %arg9: memref<16x4x32xf32, #tpu.memory_space<vmem>>, %arg10: memref<16x4x32xf32, #tpu.memory_space<vmem>>, %arg11: memref<16x4x32xf32, #tpu.memory_space<vmem>>) attributes {dimension_semantics = [#tpu.dimension_semantics<parallel>], iteration_bounds = array<i64: 1>, scalar_prefetch = 0 : i64, scratch_operands = 4 : i64, tpu.core_type = #tpu.core_type<tc>, window_params = [{transform_indices = @transform_0, window_bounds = array<i64: 16, 4, 32>}, {transform_indices = @transform_1, window_bounds = array<i64: 4, 1>}, {pipeline_mode = #tpu.pipeline_mode<synchronous>, transform_indices = @transform_2, window_bounds = array<i64: 32, 256>}, {pipeline_mode = #tpu.pipeline_mode<synchronous>, transform_indices = @transform_3, window_bounds = array<i64: 32, 128>}, {pipeline_mode = #tpu.pipeline_mode<synchronous>, transform_indices = @transform_4, window_bounds = array<i64: 32, 128>}, {pipeline_mode = #tpu.pipeline_mode<synchronous>, transform_indices = @transform_5, window_bounds = array<i64: 1, 256>}, {transform_indices = @transform_6, window_bounds = array<i64: 16, 4, 64>}]} {
    %c0 = arith.constant 0 : index
    %c0_0 = arith.constant 0 : index
    %c0_1 = arith.constant 0 : index
    %0 = vector.load %arg1[%c0, %c0_0, %c0_1] : memref<16x4x32xf32, #tpu.memory_space<vmem>>, vector<16x4x32xf32>
    %1 = vector.shape_cast %0 : vector<16x4x32xf32> to vector<64x32xf32>
    %2 = arith.truncf %1 : vector<64x32xf32> to vector<64x32xbf16>
    %c0_2 = arith.constant 0 : index
    %c0_3 = arith.constant 0 : index
    %3 = vector.load %arg3[%c0_2, %c0_3] : memref<32x256xbf16, #tpu.memory_space<vmem>>, vector<32x256xbf16>
    %cst = arith.constant dense<0.000000e+00> : vector<64x256xf32>
    %4 = tpu.matmul %2, %3, %cst {dimension_numbers = #tpu.dot_dimension_numbers<[1], [0], [0], [1], [0, 0, 1, 1], [], []>} : vector<64x32xbf16>, vector<32x256xbf16>, vector<64x256xf32> -> vector<64x256xf32>
    %c0_4 = arith.constant 0 : index
    %c0_5 = arith.constant 0 : index
    %5 = vector.load %arg6[%c0_4, %c0_5] : memref<1x256xf32, #tpu.memory_space<vmem>>, vector<1x256xf32>
    %6 = vector.broadcast %5 : vector<1x256xf32> to vector<64x256xf32>
    %7 = arith.addf %4, %6 : vector<64x256xf32>
    %8 = vector.shape_cast %7 : vector<64x256xf32> to vector<16x4x256xf32>
    %c0_6 = arith.constant 0 : index
    %c0_7 = arith.constant 0 : index
    %c0_8 = arith.constant 0 : index
    %9 = vector.load %arg8[%c0_6, %c0_7, %c0_8] : memref<16x4x256xf32, #tpu.memory_space<vmem>>, vector<16x4x256xf32>
    tpu.vector_store %arg8[%c0_6, %c0_7, %c0_8], %8 {strides = array<i32>} : memref<16x4x256xf32, #tpu.memory_space<vmem>>, vector<16x4x256xf32>,
    %10 = tpu.iota {dimensions = array<i32: 0>} : vector<16x4x32xi32>
    %c0_9 = arith.constant 0 : index
    %c0_10 = arith.constant 0 : index
    %11 = vector.load %arg2[%c0_9, %c0_10] : memref<4x1xi32, #tpu.memory_space<vmem>>, vector<4x1xi32>
    %12 = vector.shape_cast %11 : vector<4x1xi32> to vector<1x4x1xi32>
    %13 = vector.broadcast %12 : vector<1x4x1xi32> to vector<16x4x32xi32>
    %14 = arith.cmpi slt, %10, %13 : vector<16x4x32xi32>
    %15 = arith.extui %14 : vector<16x4x32xi1> to vector<16x4x32xi32>
    %16 = arith.sitofp %15 : vector<16x4x32xi32> to vector<16x4x32xf32>
    %c0_11 = arith.constant 0 : index
    %c0_12 = arith.constant 0 : index
    %c0_13 = arith.constant 0 : index
    %17 = vector.load %arg9[%c0_11, %c0_12, %c0_13] : memref<16x4x32xf32, #tpu.memory_space<vmem>>, vector<16x4x32xf32>
    tpu.vector_store %arg9[%c0_11, %c0_12, %c0_13], %16 {strides = array<i32>} : memref<16x4x32xf32, #tpu.memory_space<vmem>>, vector<16x4x32xf32>,
    %c0_14 = arith.constant 0 : index
    %c0_15 = arith.constant 0 : index
    %18 = vector.load %arg4[%c0_14, %c0_15] : memref<32x128xbf16, #tpu.memory_space<vmem>>, vector<32x128xbf16>
    %c0_16 = arith.constant 0 : index
    %c0_17 = arith.constant 0 : index
    %19 = vector.load %arg5[%c0_16, %c0_17] : memref<32x128xbf16, #tpu.memory_space<vmem>>, vector<32x128xbf16>
    %cst_18 = arith.constant 0.000000e+00 : f32
    %20 = vector.broadcast %cst_18 : f32 to vector<4x32xf32>
    %c0_i32 = arith.constant 0 : i32
    %c16_i32 = arith.constant 16 : i32
    %21 = arith.addi %c0_i32, %c16_i32 : i32
    %c1_i32 = arith.constant 1 : i32
    %22:4 = scf.for %arg12 = %c0_i32 to %21 step %c1_i32 iter_args(%arg13 = %20, %arg14 = %20, %arg15 = %20, %arg16 = %20) -> (vector<4x32xf32>, vector<4x32xf32>, vector<4x32xf32>, vector<4x32xf32>)  : i32 {
      %c15_i32 = arith.constant 15 : i32
      %27 = arith.subi %c15_i32, %arg12 : i32
      %28 = arith.index_cast %arg12 : i32 to index
      %c0_31 = arith.constant 0 : index
      %c0_32 = arith.constant 0 : index
      %29 = vector.load %arg8[%28, %c0_31, %c0_32] : memref<16x4x256xf32, #tpu.memory_space<vmem>>, vector<1x4x256xf32>
      %30 = vector.shape_cast %29 : vector<1x4x256xf32> to vector<4x256xf32>
      %31 = vector.extract_strided_slice %30 {offsets = [0, 0], sizes = [4, 128], strides = [1, 1]} : vector<4x256xf32> to vector<4x128xf32>
      %32 = arith.truncf %arg13 : vector<4x32xf32> to vector<4x32xbf16>
      %cst_33 = arith.constant dense<0.000000e+00> : vector<4x128xf32>
      %33 = tpu.matmul %32, %18, %cst_33 {dimension_numbers = #tpu.dot_dimension_numbers<[1], [0], [0], [1], [0, 0, 1, 1], [], []>} : vector<4x32xbf16>, vector<32x128xbf16>, vector<4x128xf32> -> vector<4x128xf32>
      %34 = arith.addf %31, %33 : vector<4x128xf32>
      %35 = arith.index_cast %27 : i32 to index
      %c0_34 = arith.constant 0 : index
      %c0_35 = arith.constant 0 : index
      %36 = vector.load %arg8[%35, %c0_34, %c0_35] : memref<16x4x256xf32, #tpu.memory_space<vmem>>, vector<1x4x256xf32>
      %37 = vector.shape_cast %36 : vector<1x4x256xf32> to vector<4x256xf32>
      %38 = vector.extract_strided_slice %37 {offsets = [0, 128], sizes = [4, 128], strides = [1, 1]} : vector<4x256xf32> to vector<4x128xf32>
      %39 = arith.truncf %arg15 : vector<4x32xf32> to vector<4x32xbf16>
      %cst_36 = arith.constant dense<0.000000e+00> : vector<4x128xf32>
      %40 = tpu.matmul %39, %19, %cst_36 {dimension_numbers = #tpu.dot_dimension_numbers<[1], [0], [0], [1], [0, 0, 1, 1], [], []>} : vector<4x32xbf16>, vector<32x128xbf16>, vector<4x128xf32> -> vector<4x128xf32>
      %41 = arith.addf %38, %40 : vector<4x128xf32>
      %42 = vector.extract_strided_slice %34 {offsets = [0, 0], sizes = [4, 32], strides = [1, 1]} : vector<4x128xf32> to vector<4x32xf32>
      %43 = arith.negf %42 : vector<4x32xf32>
      %44 = math.exp %43 : vector<4x32xf32>
      %cst_37 = arith.constant 1.000000e+00 : f32
      %45 = vector.broadcast %cst_37 : f32 to vector<4x32xf32>
      %46 = arith.addf %45, %44 : vector<4x32xf32>
      %47 = arith.divf %45, %46 : vector<4x32xf32>
      %48 = vector.extract_strided_slice %34 {offsets = [0, 32], sizes = [4, 32], strides = [1, 1]} : vector<4x128xf32> to vector<4x32xf32>
      %49 = arith.negf %48 : vector<4x32xf32>
      %50 = math.exp %49 : vector<4x32xf32>
      %cst_38 = arith.constant 1.000000e+00 : f32
      %51 = vector.broadcast %cst_38 : f32 to vector<4x32xf32>
      %52 = arith.addf %51, %50 : vector<4x32xf32>
      %53 = arith.divf %51, %52 : vector<4x32xf32>
      %54 = vector.extract_strided_slice %34 {offsets = [0, 64], sizes = [4, 32], strides = [1, 1]} : vector<4x128xf32> to vector<4x32xf32>
      %55 = math.tanh %54 : vector<4x32xf32>
      %56 = vector.extract_strided_slice %34 {offsets = [0, 96], sizes = [4, 32], strides = [1, 1]} : vector<4x128xf32> to vector<4x32xf32>
      %57 = arith.negf %56 : vector<4x32xf32>
      %58 = math.exp %57 : vector<4x32xf32>
      %cst_39 = arith.constant 1.000000e+00 : f32
      %59 = vector.broadcast %cst_39 : f32 to vector<4x32xf32>
      %60 = arith.addf %59, %58 : vector<4x32xf32>
      %61 = arith.divf %59, %60 : vector<4x32xf32>
      %62 = arith.mulf %53, %arg14 : vector<4x32xf32>
      %63 = arith.mulf %47, %55 : vector<4x32xf32>
      %64 = arith.addf %62, %63 : vector<4x32xf32>
      %65 = math.tanh %64 : vector<4x32xf32>
      %66 = arith.mulf %61, %65 : vector<4x32xf32>
      %67 = vector.extract_strided_slice %41 {offsets = [0, 0], sizes = [4, 32], strides = [1, 1]} : vector<4x128xf32> to vector<4x32xf32>
      %68 = arith.negf %67 : vector<4x32xf32>
      %69 = math.exp %68 : vector<4x32xf32>
      %cst_40 = arith.constant 1.000000e+00 : f32
      %70 = vector.broadcast %cst_40 : f32 to vector<4x32xf32>
      %71 = arith.addf %70, %69 : vector<4x32xf32>
      %72 = arith.divf %70, %71 : vector<4x32xf32>
      %73 = vector.extract_strided_slice %41 {offsets = [0, 32], sizes = [4, 32], strides = [1, 1]} : vector<4x128xf32> to vector<4x32xf32>
      %74 = arith.negf %73 : vector<4x32xf32>
      %75 = math.exp %74 : vector<4x32xf32>
      %cst_41 = arith.constant 1.000000e+00 : f32
      %76 = vector.broadcast %cst_41 : f32 to vector<4x32xf32>
      %77 = arith.addf %76, %75 : vector<4x32xf32>
      %78 = arith.divf %76, %77 : vector<4x32xf32>
      %79 = vector.extract_strided_slice %41 {offsets = [0, 64], sizes = [4, 32], strides = [1, 1]} : vector<4x128xf32> to vector<4x32xf32>
      %80 = math.tanh %79 : vector<4x32xf32>
      %81 = vector.extract_strided_slice %41 {offsets = [0, 96], sizes = [4, 32], strides = [1, 1]} : vector<4x128xf32> to vector<4x32xf32>
      %82 = arith.negf %81 : vector<4x32xf32>
      %83 = math.exp %82 : vector<4x32xf32>
      %cst_42 = arith.constant 1.000000e+00 : f32
      %84 = vector.broadcast %cst_42 : f32 to vector<4x32xf32>
      %85 = arith.addf %84, %83 : vector<4x32xf32>
      %86 = arith.divf %84, %85 : vector<4x32xf32>
      %87 = arith.mulf %78, %arg16 : vector<4x32xf32>
      %88 = arith.mulf %72, %80 : vector<4x32xf32>
      %89 = arith.addf %87, %88 : vector<4x32xf32>
      %90 = math.tanh %89 : vector<4x32xf32>
      %91 = arith.mulf %86, %90 : vector<4x32xf32>
      %92 = arith.index_cast %arg12 : i32 to index
      %c0_43 = arith.constant 0 : index
      %c0_44 = arith.constant 0 : index
      %93 = vector.load %arg9[%92, %c0_43, %c0_44] : memref<16x4x32xf32, #tpu.memory_space<vmem>>, vector<1x4x32xf32>
      %94 = vector.shape_cast %93 : vector<1x4x32xf32> to vector<4x32xf32>
      %95 = arith.index_cast %27 : i32 to index
      %c0_45 = arith.constant 0 : index
      %c0_46 = arith.constant 0 : index
      %96 = vector.load %arg9[%95, %c0_45, %c0_46] : memref<16x4x32xf32, #tpu.memory_space<vmem>>, vector<1x4x32xf32>
      %97 = vector.shape_cast %96 : vector<1x4x32xf32> to vector<4x32xf32>
      %98 = arith.mulf %94, %66 : vector<4x32xf32>
      %cst_47 = arith.constant 1.000000e+00 : f32
      %99 = vector.broadcast %cst_47 : f32 to vector<4x32xf32>
      %100 = arith.subf %99, %94 : vector<4x32xf32>
      %101 = arith.mulf %100, %arg13 : vector<4x32xf32>
      %102 = arith.addf %98, %101 : vector<4x32xf32>
      %103 = arith.mulf %94, %64 : vector<4x32xf32>
      %cst_48 = arith.constant 1.000000e+00 : f32
      %104 = vector.broadcast %cst_48 : f32 to vector<4x32xf32>
      %105 = arith.subf %104, %94 : vector<4x32xf32>
      %106 = arith.mulf %105, %arg14 : vector<4x32xf32>
      %107 = arith.addf %103, %106 : vector<4x32xf32>
      %108 = arith.mulf %97, %91 : vector<4x32xf32>
      %cst_49 = arith.constant 1.000000e+00 : f32
      %109 = vector.broadcast %cst_49 : f32 to vector<4x32xf32>
      %110 = arith.subf %109, %97 : vector<4x32xf32>
      %111 = arith.mulf %110, %arg15 : vector<4x32xf32>
      %112 = arith.addf %108, %111 : vector<4x32xf32>
      %113 = arith.mulf %97, %89 : vector<4x32xf32>
      %cst_50 = arith.constant 1.000000e+00 : f32
      %114 = vector.broadcast %cst_50 : f32 to vector<4x32xf32>
      %115 = arith.subf %114, %97 : vector<4x32xf32>
      %116 = arith.mulf %115, %arg16 : vector<4x32xf32>
      %117 = arith.addf %113, %116 : vector<4x32xf32>
      %118 = arith.mulf %94, %102 : vector<4x32xf32>
      %119 = arith.index_cast %arg12 : i32 to index
      %c0_51 = arith.constant 0 : index
      %c0_52 = arith.constant 0 : index
      %120 = vector.load %arg10[%119, %c0_51, %c0_52] : memref<16x4x32xf32, #tpu.memory_space<vmem>>, vector<1x4x32xf32>
      %121 = vector.shape_cast %120 : vector<1x4x32xf32> to vector<4x32xf32>
      %122 = vector.shape_cast %118 : vector<4x32xf32> to vector<1x4x32xf32>
      tpu.vector_store %arg10[%119, %c0_51, %c0_52], %122 {strides = array<i32>} : memref<16x4x32xf32, #tpu.memory_space<vmem>>, vector<1x4x32xf32>,
      %123 = arith.mulf %97, %112 : vector<4x32xf32>
      %124 = arith.index_cast %27 : i32 to index
      %c0_53 = arith.constant 0 : index
      %c0_54 = arith.constant 0 : index
      %125 = vector.load %arg11[%124, %c0_53, %c0_54] : memref<16x4x32xf32, #tpu.memory_space<vmem>>, vector<1x4x32xf32>
      %126 = vector.shape_cast %125 : vector<1x4x32xf32> to vector<4x32xf32>
      %127 = vector.shape_cast %123 : vector<4x32xf32> to vector<1x4x32xf32>
      tpu.vector_store %arg11[%124, %c0_53, %c0_54], %127 {strides = array<i32>} : memref<16x4x32xf32, #tpu.memory_space<vmem>>, vector<1x4x32xf32>,
      scf.yield %102, %107, %112, %117 : vector<4x32xf32>, vector<4x32xf32>, vector<4x32xf32>, vector<4x32xf32>
    }
    %c16_i32_19 = arith.constant 16 : i32
    %c0_20 = arith.constant 0 : index
    %c0_21 = arith.constant 0 : index
    %c0_22 = arith.constant 0 : index
    %23 = vector.load %arg10[%c0_20, %c0_21, %c0_22] : memref<16x4x32xf32, #tpu.memory_space<vmem>>, vector<16x4x32xf32>
    %c0_23 = arith.constant 0 : index
    %c0_24 = arith.constant 0 : index
    %c0_25 = arith.constant 0 : index
    %24 = vector.load %arg7[%c0_23, %c0_24, %c0_25] : memref<16x4x64xf32, #tpu.memory_space<vmem>>, vector<16x4x32xf32>
    tpu.vector_store %arg7[%c0_23, %c0_24, %c0_25], %23 {strides = array<i32>} : memref<16x4x64xf32, #tpu.memory_space<vmem>>, vector<16x4x32xf32>,
    %c0_26 = arith.constant 0 : index
    %c0_27 = arith.constant 0 : index
    %c0_28 = arith.constant 0 : index
    %25 = vector.load %arg11[%c0_26, %c0_27, %c0_28] : memref<16x4x32xf32, #tpu.memory_space<vmem>>, vector<16x4x32xf32>
    %c0_29 = arith.constant 0 : index
    %c0_30 = arith.constant 0 : index
    %c32 = arith.constant 32 : index
    %26 = vector.load %arg7[%c0_29, %c0_30, %c32] : memref<16x4x64xf32, #tpu.memory_space<vmem>>, vector<16x4x32xf32>
    tpu.vector_store %arg7[%c0_29, %c0_30, %c32], %25 {strides = array<i32>} : memref<16x4x64xf32, #tpu.memory_space<vmem>>, vector<16x4x32xf32>,
    return
  }
  func.func @transform_0(%arg0: i32) -> (i32, i32, i32) {
    %c0_i32 = arith.constant 0 : i32
    %c0_i32_0 = arith.constant 0 : i32
    %c0_i32_1 = arith.constant 0 : i32
    return %c0_i32, %arg0, %c0_i32_0 : i32, i32, i32
  }
  func.func @transform_1(%arg0: i32) -> (i32, i32) {
    %c0_i32 = arith.constant 0 : i32
    %c0_i32_0 = arith.constant 0 : i32
    return %arg0, %c0_i32 : i32, i32
  }
  func.func @transform_2(%arg0: i32) -> (i32, i32) {
    %c0_i32 = arith.constant 0 : i32
    %c0_i32_0 = arith.constant 0 : i32
    %c0_i32_1 = arith.constant 0 : i32
    return %c0_i32, %c0_i32_0 : i32, i32
  }
  func.func @transform_3(%arg0: i32) -> (i32, i32) {
    %c0_i32 = arith.constant 0 : i32
    %c0_i32_0 = arith.constant 0 : i32
    %c0_i32_1 = arith.constant 0 : i32
    return %c0_i32, %c0_i32_0 : i32, i32
  }
  func.func @transform_4(%arg0: i32) -> (i32, i32) {
    %c0_i32 = arith.constant 0 : i32
    %c0_i32_0 = arith.constant 0 : i32
    %c0_i32_1 = arith.constant 0 : i32
    return %c0_i32, %c0_i32_0 : i32, i32
  }
  func.func @transform_5(%arg0: i32) -> (i32, i32) {
    %c0_i32 = arith.constant 0 : i32
    %c0_i32_0 = arith.constant 0 : i32
    %c0_i32_1 = arith.constant 0 : i32
    return %c0_i32, %c0_i32_0 : i32, i32
  }
  func.func @transform_6(%arg0: i32) -> (i32, i32, i32) {
    %c0_i32 = arith.constant 0 : i32
    %c0_i32_0 = arith.constant 0 : i32
    %c0_i32_1 = arith.constant 0 : i32
    return %c0_i32, %arg0, %c0_i32_0 : i32, i32, i32
  }
}

module attributes {stable_mosaic.version = 11 : i64} {
  func.func @linear_out_kernel(%arg0: i32, %arg1: memref<2x24x64xf32, #tpu.memory_space<vmem>>, %arg2: memref<2x24xf32, #tpu.memory_space<vmem>>, %arg3: memref<1x1x64xf32, #tpu.memory_space<vmem>>, %arg4: memref<1x1xf32, #tpu.memory_space<vmem>>, %arg5: memref<1x1x64xf32, #tpu.memory_space<vmem>>, %arg6: memref<1x1xf32, #tpu.memory_space<vmem>>, %arg7: memref<2x24xf32, #tpu.memory_space<vmem>>, %arg8: memref<2x24xf32, #tpu.memory_space<vmem>>) attributes {dimension_semantics = [#tpu.dimension_semantics<parallel>], iteration_bounds = array<i64: 1>, scalar_prefetch = 0 : i64, scratch_operands = 0 : i64, tpu.core_type = #tpu.core_type<tc>, window_params = [{transform_indices = @transform_0, window_bounds = array<i64: 2, 24, 64>}, {transform_indices = @transform_1, window_bounds = array<i64: 2, 24>}, {pipeline_mode = #tpu.pipeline_mode<synchronous>, transform_indices = @transform_2, window_bounds = array<i64: 1, 1, 64>}, {pipeline_mode = #tpu.pipeline_mode<synchronous>, transform_indices = @transform_3, window_bounds = array<i64: 1, 1>}, {pipeline_mode = #tpu.pipeline_mode<synchronous>, transform_indices = @transform_4, window_bounds = array<i64: 1, 1, 64>}, {pipeline_mode = #tpu.pipeline_mode<synchronous>, transform_indices = @transform_5, window_bounds = array<i64: 1, 1>}, {transform_indices = @transform_6, window_bounds = array<i64: 2, 24>}, {transform_indices = @transform_7, window_bounds = array<i64: 2, 24>}]} {
    %c0 = arith.constant 0 : index
    %c0_0 = arith.constant 0 : index
    %c0_1 = arith.constant 0 : index
    %0 = vector.load %arg1[%c0, %c0_0, %c0_1] : memref<2x24x64xf32, #tpu.memory_space<vmem>>, vector<2x24x64xf32>
    %c0_2 = arith.constant 0 : index
    %c0_3 = arith.constant 0 : index
    %1 = vector.load %arg2[%c0_2, %c0_3] : memref<2x24xf32, #tpu.memory_space<vmem>>, vector<2x24xf32>
    %c0_4 = arith.constant 0 : index
    %c0_5 = arith.constant 0 : index
    %c0_6 = arith.constant 0 : index
    %2 = vector.load %arg3[%c0_4, %c0_5, %c0_6] : memref<1x1x64xf32, #tpu.memory_space<vmem>>, vector<1x1x64xf32>
    %c0_7 = arith.constant 0 : index
    %c0_8 = arith.constant 0 : index
    %3 = vector.load %arg4[%c0_7, %c0_8] : memref<1x1xf32, #tpu.memory_space<vmem>>, vector<1x1xf32>
    %4 = vector.broadcast %2 : vector<1x1x64xf32> to vector<2x24x64xf32>
    %5 = arith.mulf %0, %4 : vector<2x24x64xf32>
    %cst = arith.constant dense<0.000000e+00> : vector<2x24xf32>
    %6 = vector.multi_reduction <add>, %5, %cst [2] : vector<2x24x64xf32> to vector<2x24xf32>
    %7 = vector.broadcast %3 : vector<1x1xf32> to vector<2x24xf32>
    %8 = arith.addf %6, %7 : vector<2x24xf32>
    %9 = arith.mulf %1, %8 : vector<2x24xf32>
    %cst_9 = arith.constant 1.000000e+00 : f32
    %10 = vector.broadcast %cst_9 : f32 to vector<2x24xf32>
    %11 = arith.subf %10, %1 : vector<2x24xf32>
    %cst_10 = arith.constant -1.000000e+30 : f32
    %12 = vector.broadcast %cst_10 : f32 to vector<2x24xf32>
    %13 = arith.mulf %11, %12 : vector<2x24xf32>
    %14 = arith.addf %9, %13 : vector<2x24xf32>
    %cst_11 = arith.constant dense<0xFF800000> : vector<2xf32>
    %15 = vector.multi_reduction <maximumf>, %14, %cst_11 [1] : vector<2x24xf32> to vector<2xf32>
    %16 = vector.shape_cast %15 : vector<2xf32> to vector<2x1xf32>
    %17 = vector.broadcast %16 : vector<2x1xf32> to vector<2x24xf32>
    %18 = arith.subf %14, %17 : vector<2x24xf32>
    %19 = math.exp %18 : vector<2x24xf32>
    %cst_12 = arith.constant dense<0.000000e+00> : vector<2xf32>
    %20 = vector.multi_reduction <add>, %19, %cst_12 [1] : vector<2x24xf32> to vector<2xf32>
    %21 = vector.shape_cast %20 : vector<2xf32> to vector<2x1xf32>
    %22 = math.log %21 : vector<2x1xf32>
    %23 = vector.broadcast %16 : vector<2x1xf32> to vector<2x24xf32>
    %24 = arith.subf %14, %23 : vector<2x24xf32>
    %25 = vector.broadcast %22 : vector<2x1xf32> to vector<2x24xf32>
    %26 = arith.subf %24, %25 : vector<2x24xf32>
    %c0_13 = arith.constant 0 : index
    %c0_14 = arith.constant 0 : index
    %27 = vector.load %arg7[%c0_13, %c0_14] : memref<2x24xf32, #tpu.memory_space<vmem>>, vector<2x24xf32>
    tpu.vector_store %arg7[%c0_13, %c0_14], %26 {strides = array<i32>} : memref<2x24xf32, #tpu.memory_space<vmem>>, vector<2x24xf32>,
    %c0_15 = arith.constant 0 : index
    %c0_16 = arith.constant 0 : index
    %c0_17 = arith.constant 0 : index
    %28 = vector.load %arg5[%c0_15, %c0_16, %c0_17] : memref<1x1x64xf32, #tpu.memory_space<vmem>>, vector<1x1x64xf32>
    %c0_18 = arith.constant 0 : index
    %c0_19 = arith.constant 0 : index
    %29 = vector.load %arg6[%c0_18, %c0_19] : memref<1x1xf32, #tpu.memory_space<vmem>>, vector<1x1xf32>
    %30 = vector.broadcast %28 : vector<1x1x64xf32> to vector<2x24x64xf32>
    %31 = arith.mulf %0, %30 : vector<2x24x64xf32>
    %cst_20 = arith.constant dense<0.000000e+00> : vector<2x24xf32>
    %32 = vector.multi_reduction <add>, %31, %cst_20 [2] : vector<2x24x64xf32> to vector<2x24xf32>
    %33 = vector.broadcast %29 : vector<1x1xf32> to vector<2x24xf32>
    %34 = arith.addf %32, %33 : vector<2x24xf32>
    %35 = arith.mulf %1, %34 : vector<2x24xf32>
    %cst_21 = arith.constant 1.000000e+00 : f32
    %36 = vector.broadcast %cst_21 : f32 to vector<2x24xf32>
    %37 = arith.subf %36, %1 : vector<2x24xf32>
    %cst_22 = arith.constant -1.000000e+30 : f32
    %38 = vector.broadcast %cst_22 : f32 to vector<2x24xf32>
    %39 = arith.mulf %37, %38 : vector<2x24xf32>
    %40 = arith.addf %35, %39 : vector<2x24xf32>
    %cst_23 = arith.constant dense<0xFF800000> : vector<2xf32>
    %41 = vector.multi_reduction <maximumf>, %40, %cst_23 [1] : vector<2x24xf32> to vector<2xf32>
    %42 = vector.shape_cast %41 : vector<2xf32> to vector<2x1xf32>
    %43 = vector.broadcast %42 : vector<2x1xf32> to vector<2x24xf32>
    %44 = arith.subf %40, %43 : vector<2x24xf32>
    %45 = math.exp %44 : vector<2x24xf32>
    %cst_24 = arith.constant dense<0.000000e+00> : vector<2xf32>
    %46 = vector.multi_reduction <add>, %45, %cst_24 [1] : vector<2x24xf32> to vector<2xf32>
    %47 = vector.shape_cast %46 : vector<2xf32> to vector<2x1xf32>
    %48 = math.log %47 : vector<2x1xf32>
    %49 = vector.broadcast %42 : vector<2x1xf32> to vector<2x24xf32>
    %50 = arith.subf %40, %49 : vector<2x24xf32>
    %51 = vector.broadcast %48 : vector<2x1xf32> to vector<2x24xf32>
    %52 = arith.subf %50, %51 : vector<2x24xf32>
    %c0_25 = arith.constant 0 : index
    %c0_26 = arith.constant 0 : index
    %53 = vector.load %arg8[%c0_25, %c0_26] : memref<2x24xf32, #tpu.memory_space<vmem>>, vector<2x24xf32>
    tpu.vector_store %arg8[%c0_25, %c0_26], %52 {strides = array<i32>} : memref<2x24xf32, #tpu.memory_space<vmem>>, vector<2x24xf32>,
    return
  }
  func.func @transform_0(%arg0: i32) -> (i32, i32, i32) {
    %c0_i32 = arith.constant 0 : i32
    %c0_i32_0 = arith.constant 0 : i32
    %c0_i32_1 = arith.constant 0 : i32
    return %arg0, %c0_i32, %c0_i32_0 : i32, i32, i32
  }
  func.func @transform_1(%arg0: i32) -> (i32, i32) {
    %c0_i32 = arith.constant 0 : i32
    %c0_i32_0 = arith.constant 0 : i32
    return %arg0, %c0_i32 : i32, i32
  }
  func.func @transform_2(%arg0: i32) -> (i32, i32, i32) {
    %c0_i32 = arith.constant 0 : i32
    %c0_i32_0 = arith.constant 0 : i32
    %c0_i32_1 = arith.constant 0 : i32
    %c0_i32_2 = arith.constant 0 : i32
    return %c0_i32, %c0_i32_0, %c0_i32_1 : i32, i32, i32
  }
  func.func @transform_3(%arg0: i32) -> (i32, i32) {
    %c0_i32 = arith.constant 0 : i32
    %c0_i32_0 = arith.constant 0 : i32
    %c0_i32_1 = arith.constant 0 : i32
    return %c0_i32, %c0_i32_0 : i32, i32
  }
  func.func @transform_4(%arg0: i32) -> (i32, i32, i32) {
    %c0_i32 = arith.constant 0 : i32
    %c0_i32_0 = arith.constant 0 : i32
    %c0_i32_1 = arith.constant 0 : i32
    %c0_i32_2 = arith.constant 0 : i32
    return %c0_i32, %c0_i32_0, %c0_i32_1 : i32, i32, i32
  }
  func.func @transform_5(%arg0: i32) -> (i32, i32) {
    %c0_i32 = arith.constant 0 : i32
    %c0_i32_0 = arith.constant 0 : i32
    %c0_i32_1 = arith.constant 0 : i32
    return %c0_i32, %c0_i32_0 : i32, i32
  }
  func.func @transform_6(%arg0: i32) -> (i32, i32) {
    %c0_i32 = arith.constant 0 : i32
    %c0_i32_0 = arith.constant 0 : i32
    return %arg0, %c0_i32 : i32, i32
  }
  func.func @transform_7(%arg0: i32) -> (i32, i32) {
    %c0_i32 = arith.constant 0 : i32
    %c0_i32_0 = arith.constant 0 : i32
    return %arg0, %c0_i32 : i32, i32
  }
}

</mosaic_0001>

<bundles_post_ra>
// kernel: forward.5
= control target key start
LH: loop header
LB: loop body
LE: loop exit
PB: predicated region body
PF: predicated region fallthrough
CT: control target
= control target key end

     0   :  { %s407_s0 = inlined_call_operand.vmem [shape: f32[2,24,64], index: 0, kind: input, shape index: {}]   ;;  %s408_s1 = inlined_call_operand.vmem [shape: f32[2,24], index: 1, kind: input, shape index: {}]   ;;  %s409_s2 = inlined_call_operand.vmem [shape: f32[1,1,64], index: 2, kind: input, shape index: {}]   ;;  %s410_s3 = inlined_call_operand.<no memory space> [shape: f32[1,1], index: 3, kind: input, shape index: {}]   ;;  %s411_s4 = inlined_call_operand.vmem [shape: f32[1,1,64], index: 4, kind: input, shape index: {}]   ;;  %s412_s6 = inlined_call_operand.hbm [shape: f32[2,24], index: 6, kind: output, shape index: {0}]   ;;  %s413_s7 = inlined_call_operand.hbm [shape: f32[2,24], index: 7, kind: output, shape index: {1}]   ;;  %s414_s5 = inlined_call_operand.<no memory space> [shape: f32[1,1], index: 5, kind: input, shape index: {}]  }
   0x1   :  { %v13_v0 = vstv %s410_s3  ;;  %v15_v1 = vstv %s414_s5 }
   0x2   :  { %14 = vst [vmem:[#allocation2] sm:$0x1] %v13_v0 }
   0x3   :  { %16 = vst [vmem:[#allocation3] sm:$0x1] %v15_v1 }
   0x4   :  { %17 = vsyncpa [#allocation5], 0  ;;  %v34_v2 = vld [vmem:[%s407_s0 + $0x18] sm:$0xff]  ;;  %v235_v3 = vld [vmem:[%s409_s2] ss:$0 sm:$0xff]  ;;  %vm49_vm0 = vcmask 523264  }
   0x5   :  { %v31_v4 = vld [vmem:[%s407_s0] sm:$0xff]  ;;  %v46_v6 = vmul.f32 %v235_v3, %v34_v2  ;;  %v32_v10 = vld [vmem:[%s407_s0 + $0x8] sm:$0xff] }
   0x6   :  { %v236_v5 = vld [vmem:[%s411_s4] ss:$0 sm:$0xff]  ;;  %v43_v7 = vmul.f32 %v235_v3, %v31_v4 }
   0x7   :  { %v35_v8 = vld [vmem:[%s407_s0 + $0x20] sm:$0xff]  ;;  %v128_v9 = vmul.f32 %v236_v5, %v31_v4  ;;  %v59_v11 = vsel %vm49_vm0, %v46_v6, 0.0 }
   0x8   :  { %v50_v12 = vsel %vm49_vm0, %v43_v7, 0.0 }
   0x9   :  { %18 = vsyncpa [#allocation7], 0  ;;  %60 = vadd.xlane.f32.xlu1 %v59_v11  ;;  %v134_v13 = vsel %vm49_vm0, %v128_v9, 0.0  ;;  %51 = vadd.xlane.f32.xlu0 %v50_v12  ;;  %v47_v14 = vmul.f32 %v235_v3, %v35_v8  ;;  %v44_v15 = vmul.f32 %v235_v3, %v32_v10  ;;  %v129_v16 = vmul.f32 %v236_v5, %v32_v10  ;;  %v33_v21 = vld [vmem:[%s407_s0 + $0x10] sm:$0xff]  ;;  %v36_v28 = vld [vmem:[%s407_s0 + $0x28] sm:$0xff]  ;;  %s204_s21 = sshll.u32 %s412_s6, 4  ;;  %s205_s21 = int_to_ptr.hbm [resolvable:$true] %s204_s21 }
   0xa   :  { %135 = vadd.xlane.f32.xlu2 %v134_v13  ;;  %v299_v17 = vmov 0   ;;  %v132_v22 = vmul.f32 %v236_v5, %v35_v8  ;;  %v131_v23 = vmul.f32 %v236_v5, %v34_v2  ;;  %v45_v24 = vmul.f32 %v235_v3, %v33_v21  ;;  %v237_v35 = vld [vmem:[#allocation2] ss:$0 sm:$0xff]  ;;  %v238_v36 = vld [vmem:[#allocation3] ss:$0 sm:$0xff]  ;;  %s301_s22 = smov [#allocation6]  }
   0xb   :  { %232 = vset.pattern.permute.xlu1 %v299_v17  ;;  %233 = vset.pattern.permute.xlu2 %v299_v17  ;;  %v62_v18 = vsel %vm49_vm0, %v47_v14, 0.0  ;;  %v53_v19 = vsel %vm49_vm0, %v44_v15, 0.0  ;;  %v137_v20 = vsel %vm49_vm0, %v129_v16, 0.0  ;;  %v48_v29 = vmul.f32 %v235_v3, %v36_v28  ;;  %v37_v9 = vld [vmem:[%s408_s1] sm:$0x3]  ;;  %s300_s1 = smov [#allocation4]  }
   0xc   :  { %234 = vset.pattern.permute.xlu0 %v299_v17  ;;  %v146_v25 = vsel %vm49_vm0, %v132_v22, 0.0  ;;  %v143_v26 = vsel %vm49_vm0, %v131_v23, 0.0  ;;  %v56_v27 = vsel %vm49_vm0, %v45_v24, 0.0  ;;  %v130_v30 = vmul.f32 %v236_v5, %v33_v21  ;;  %s202_s18 = sshll.u32 %s300_s1, 4  ;;  %s213_s23 = sshll.u32 %s301_s22, 4  ;;  %s203_s18 = int_to_ptr.vmem [resolvable:$true] %s202_s18  ;;  %s214_s23 = int_to_ptr.vmem [resolvable:$true] %s213_s23 }
   0xd   :  { %v65_v31 = vsel %vm49_vm0, %v48_v29, 0.0  ;;  %v133_v33 = vmul.f32 %v236_v5, %v36_v28  ;;  %v86_v47 = vlaneseq  ;;  %vm91_vm1 = vcmask 130112   ;;  %s215_s26 = sshll.u32 %s413_s7, 4  ;;  %s216_s26 = int_to_ptr.hbm [resolvable:$true] %s215_s26 }
   0xe   :  { %v140_v32 = vsel %vm49_vm0, %v130_v30, 0.0  ;;  %vm95_vm2 = vcmask 195712   ;;  %vm102_vm3 = vcmask 1041409   ;;  %vm109_vm4 = vcmask 189440  }
   0xf   :  { %v149_v34 = vsel %vm49_vm0, %v133_v33, 0.0  ;;  %v87_v48 = vand.u32 127, %v86_v47 }
  0x11   :  { %63 = vadd.xlane.f32.xlu1 %v62_v18  ;;  %54 = vadd.xlane.f32.xlu0 %v53_v19  ;;  %v89_v51 = vadd.s32 4294967288, %v87_v48  ;;  %v93_v57 = vadd.s32 4294967280, %v87_v48  ;;  %v106_v19 = vsub.f32 1.0, %v37_v9 }
  0x12   :  { %138 = vadd.xlane.f32.xlu2 %v137_v20 }
  0x19   :  { %147 = vadd.xlane.f32.xlu1 %v146_v25  ;;  %144 = vadd.xlane.f32.xlu0 %v143_v26 }
  0x1a   :  { %57 = vadd.xlane.f32.xlu2 %v56_v27  ;;  %v107_v27 = vmul.f32 -1e+30, %v106_v19 }
  0x21   :  { %66 = vadd.xlane.f32.xlu0 %v65_v31 }
  0x22   :  { %141 = vadd.xlane.f32.xlu2 %v140_v32 }
  0x29   :  { %150 = vadd.xlane.f32.xlu0 %v149_v34 }
  0x32   :  { %71 = vperm.xlu1 %232, %v237_v35  }
  0x3a   :  { %155 = vperm.xlu2 %233, %v238_v36  }
  0x7c   :  { %v52_v37 = vpop.xlane.xlu0 %51  ;;  %v61_v41 = vpop.xlane.xlu1 %60 }
  0x7d   :  { %v136_v38 = vpop.xlane.xlu2 %135 }
  0x84   :  { %v55_v39 = vpop.xlane.xlu0 %54  ;;  %v64_v44 = vpop.xlane.xlu1 %63 }
  0x85   :  { %v139_v40 = vpop.xlane.xlu2 %138 }
  0x8c   :  { %v145_v42 = vpop.xlane.xlu0 %144  ;;  %v148_v49 = vpop.xlane.xlu1 %147 }
  0x8d   :  { %v58_v43 = vpop.xlane.xlu2 %57 }
  0x94   :  { %v67_v46 = vpop.xlane.xlu0 %66 }
  0x95   :  { %v142_v45 = vpop.xlane.xlu2 %141 }
  0x9c   :  { %v151_v52 = vpop.xlane.xlu0 %150 }
  0x9d   :  { %v156_v50 = vpop.permute.xlu2 %155 }
  0x9e   :  { %v158_v53 = vadd.f32 %v156_v50, %v136_v38  ;;  %v159_v54 = vadd.f32 %v156_v50, %v139_v40  ;;  %v161_v55 = vadd.f32 %v156_v50, %v145_v42  ;;  %v162_v56 = vadd.f32 %v156_v50, %v148_v49 }
  0x9f   :  { %v160_v58 = vadd.f32 %v156_v50, %v142_v45  ;;  %v163_v59 = vadd.f32 %v156_v50, %v151_v52 }
  0xa0   :  { %v170_v60 = vperm.slane %v158_v53, %v87_v48  ;;  %v171_v61 = vperm.slane %v159_v54, %v89_v51  ;;  %v175_v62 = vperm.slane %v161_v55, %v87_v48  ;;  %v176_v63 = vperm.slane %v162_v56, %v89_v51 }
  0xa1   :  { %v173_v5 = vperm.slane %v160_v58, %v93_v57  ;;  %v178_v6 = vperm.slane %v163_v59, %v93_v57 }
  0xa2   :  { %v177_v14 = vsel %vm91_vm1, %v176_v63, %v175_v62  ;;  %v172_v17 = vsel %vm91_vm1, %v171_v61, %v170_v60 }
  0xa3   :  { %v179_v22 = vsel %vm95_vm2, %v178_v6, %v177_v14  ;;  %v174_v24 = vsel %vm95_vm2, %v173_v5, %v172_v17 }
  0xa4   :  { %v72_v0 = vpop.permute.xlu1 %71  ;;  %v180_v28 = vsel %vm102_vm3, %v179_v22, %v174_v24 }
  0xa5   :  { %v74_v1 = vadd.f32 %v72_v0, %v52_v37  ;;  %v75_v2 = vadd.f32 %v72_v0, %v55_v39  ;;  %v76_v3 = vadd.f32 %v72_v0, %v58_v43  ;;  %v77_v4 = vadd.f32 %v72_v0, %v61_v41 }
  0xa6   :  { %v78_v7 = vadd.f32 %v72_v0, %v64_v44  ;;  %v79_v8 = vadd.f32 %v72_v0, %v67_v46  ;;  %v182_v31 = vmul.f32 %v180_v28, %v37_v9 }
  0xa7   :  { %v88_v10 = vperm.slane %v74_v1, %v87_v48  ;;  %v90_v11 = vperm.slane %v75_v2, %v89_v51  ;;  %v97_v12 = vperm.slane %v77_v4, %v87_v48  ;;  %v94_v13 = vperm.slane %v76_v3, %v93_v57 }
  0xa8   :  { %v98_v15 = vperm.slane %v78_v7, %v89_v51  ;;  %v100_v16 = vperm.slane %v79_v8, %v93_v57  ;;  %v183_v32 = vadd.f32 %v182_v31, %v107_v27 }
  0xa9   :  { %v92_v18 = vsel %vm91_vm1, %v90_v11, %v88_v10 }
  0xaa   :  { %v96_v20 = vsel %vm95_vm2, %v94_v13, %v92_v18  ;;  %v99_v21 = vsel %vm91_vm1, %v98_v15, %v97_v12  ;;  %v184_v33 = vsel %vm109_vm4, %v183_v32, -inf }
  0xab   :  { %v101_v23 = vsel %vm95_vm2, %v100_v16, %v99_v21 }
  0xac   :  { %v103_v25 = vsel %vm102_vm3, %v101_v23, %v96_v20 }
  0xad   :  { %v105_v26 = vmul.f32 %v103_v25, %v37_v9 }
  0xaf   :  { %v108_v29 = vadd.f32 %v107_v27, %v105_v26 }
  0xb1   :  { %v110_v30 = vsel %vm109_vm4, %v108_v29, -inf }
  0xb2   :  { %111 = vmax.xlane.f32.xlu0 %v110_v30 }
  0xba   :  { %185 = vmax.xlane.f32.xlu0 %v184_v33 }
 0x125   :  { %v112_v34 = vpop.xlane.xlu0 %111 }
 0x126   :  { %v113_v35 = vsub.f32 %v108_v29, %v112_v34 }
 0x128   :  { %v114_v36 = vmul.f32 1.442695, %v113_v35 }
 0x12a   :  { %239 = vpow2.f32 %v114_v36 }
 0x12d   :  { %v186_v37 = vpop.xlane.xlu0 %185 }
 0x12e   :  { %v187_v38 = vsub.f32 %v183_v32, %v186_v37 }
 0x130   :  { %v240_v39 = vpop.eup %239  ;;  %v188_v40 = vmul.f32 1.442695, %v187_v38 }
 0x131   :  { %v116_v41 = vsel %vm109_vm4, %v240_v39, 0.0 }
 0x132   :  { %241 = vpow2.f32 %v188_v40  ;;  %117 = vadd.xlane.f32.xlu1 %v116_v41 }
 0x138   :  { %v242_v42 = vpop.eup %241 }
 0x139   :  { %v190_v43 = vsel %vm109_vm4, %v242_v42, 0.0 }
 0x13a   :  { %191 = vadd.xlane.f32.xlu0 %v190_v43 }
 0x1a5   :  { %v118_v44 = vpop.xlane.xlu1 %117 }
 0x1a6   :  { %243 = vlog2.f32 %v118_v44 }
 0x1ac   :  { %v244_v45 = vpop.eup %243 }
 0x1ad   :  { %v120_v46 = vmul.f32 0.6931472, %v244_v45  ;;  %v192_v47 = vpop.xlane.xlu0 %191 }
 0x1ae   :  { %245 = vlog2.f32 %v192_v47 }
 0x1af   :  { %v121_v48 = vsub.f32 %v113_v35, %v120_v46 }
 0x1b1   :  { %122 = vst.msk [vmem:[#allocation4] sm:$0x3] %vm109_vm4, %v121_v48 }
 0x1b2   :  { %207 = dma.vmem_to_hbm [thread:$0]  %s203_s18, 32, %s205_s21, [#allocation5]  }
 0x1b4   :  { %v246_v49 = vpop.eup %245 }
 0x1b5   :  { %v194_v50 = vmul.f32 0.6931472, %v246_v49 }
 0x1b7   :  { %v195_v51 = vsub.f32 %v187_v38, %v194_v50 }
 0x1b9   :  { %196 = vst.msk [vmem:[#allocation6] sm:$0x3] %vm109_vm4, %v195_v51 }
 0x1ba   :  { %218 = dma.vmem_to_hbm [thread:$0]  %s214_s23, 32, %s216_s26, [#allocation7]  }
 0x1bb   :  { %295 = dma.done.wait [#allocation5], 32  }
 0x1bc   :  { %296 = vsyncadd [#allocation5], 4294967264 }
 0x1bd   :  { %297 = dma.done.wait [#allocation7], 32  }
 0x1be   :  { %298 = vsyncadd [#allocation7], 4294967264 }
 0x1bf   :  { %227 = vsyncpa [#allocation5], 1 }
 0x1c0   :  { %228 = vsyncpa [#allocation7], 1 }

// kernel: forward.3
= control target key start
LH: loop header
LB: loop body
LE: loop exit
PB: predicated region body
PF: predicated region fallthrough
CT: control target
= control target key end

     0   :  { %vm77_vm0 = vcmask 523264   ;;  %vm134_vm1 = vcmask 261120   ;;  %s1031_s1 = inlined_call_operand.vmem [shape: bf16[64,32], index: 1, kind: input, shape index: {}]   ;;  %s1032_s0 = inlined_call_operand.vmem [shape: f32[48,64], index: 0, kind: input, shape index: {}]   ;;  %s1033_s5 = inlined_call_operand.vmem [shape: f32[1,32], index: 5, kind: input, shape index: {}]   ;;  %s1034_s4 = inlined_call_operand.vmem [shape: bf16[32,32], index: 4, kind: input, shape index: {}]   ;;  %s1035_s2 = inlined_call_operand.vmem [shape: bf16[32,32], index: 2, kind: input, shape index: {}]   ;;  %s1036_s3 = inlined_call_operand.vmem [shape: f32[1,32], index: 3, kind: input, shape index: {}]   ;;  %s1037_s7 = inlined_call_operand.vmem [shape: f32[1,32], index: 7, kind: input, shape index: {}]   ;;  %s1038_s8 = inlined_call_operand.vmem [shape: bf16[32,32], index: 8, kind: input, shape index: {}]   ;;  %s1039_s6 = inlined_call_operand.vmem [shape: bf16[32,32], index: 6, kind: input, shape index: {}]   ;;  %s1040_s9 = inlined_call_operand.vmem [shape: f32[1,32], index: 9, kind: input, shape index: {}]   ;;  %s1041_s10 = inlined_call_operand.vmem [shape: f32[48,32], index: 10, kind: output, shape index: {}]  }
   0x1   :  { %v688_v0 = vld [vmem:[%s1031_s1 + $0x18] sm:$0xff]  ;;  %v687_v1 = vld [vmem:[%s1031_s1 + $0x10] sm:$0xff]  ;;  %v686_v2 = vld [vmem:[%s1031_s1 + $0x8] sm:$0xff] }
   0x2   :  { %91 = vmatpush.bf16.msra.mxu0 %v688_v0  ;;  %v685_v3 = vld [vmem:[%s1031_s1] sm:$0xff]  ;;  %v37_v5 = vld [vmem:[%s1032_s0 + $0x8] sm:$0xff]  ;;  %v38_v7 = vld [vmem:[%s1032_s0 + $0x10] sm:$0xff] }
   0x3   :  { %v36_v4 = vld [vmem:[%s1032_s0] sm:$0xff]  ;;  %v39_v8 = vld [vmem:[%s1032_s0 + $0x18] sm:$0xff]  ;;  %v41_v11 = vld [vmem:[%s1032_s0 + $0x28] sm:$0xff] }
   0x4   :  { %v42_v6 = vpack.c.bf16 %v37_v5, %v36_v4  ;;  %v43_v9 = vpack.c.bf16 %v39_v8, %v38_v7  ;;  %v40_v10 = vld [vmem:[%s1032_s0 + $0x20] sm:$0xff]  ;;  %v690_v13 = vld [vmem:[%s1034_s4 + $0x8] sm:$0xff] }
   0x5   :  { %v44_v12 = vpack.c.bf16 %v41_v11, %v40_v10  ;;  %150 = vmatpush.bf16.msra.mxu1 %v690_v13  ;;  %697 = vmatpush.bf16.msra.mxu2 %v690_v13  ;;  %v689_v14 = vld [vmem:[%s1034_s4] sm:$0xff]  ;;  %v692_v15 = vld [vmem:[%s1035_s2 + $0x8] sm:$0xff] }
   0x6   :  { %92 = vmatpush.bf16.msra.mxu0 %v687_v1  ;;  %698 = vmatpush.bf16.msra.mxu3 %v690_v13  ;;  %v691_v17 = vld [vmem:[%s1035_s2] sm:$0xff]  ;;  %v694_v35 = vld [vmem:[%s1038_s8 + $0x8] sm:$0xff] }
   0x7   :  { %v877_v26 = vld [vmem:[%s1033_s5] ss:$0 sm:$0xff]  ;;  %v696_v36 = vld [vmem:[%s1039_s6 + $0x8] sm:$0xff] }
   0x8   :  { %v693_v39 = vld [vmem:[%s1038_s8] sm:$0xff] }
   0x9   :  { %151 = vmatpush.bf16.msra.mxu1 %v689_v14  ;;  %699 = vmatpush.bf16.msra.mxu2 %v689_v14  ;;  %v695_v40 = vld [vmem:[%s1039_s6] sm:$0xff] }
   0xa   :  { %93 = vmatpush.bf16.msra.mxu0 %v686_v2  ;;  %700 = vmatpush.bf16.msra.mxu3 %v689_v14  ;;  %v901_v59 = vld [vmem:[%s1036_s3] ss:$0 sm:$0xff] }
   0xd   :  { %308 = vmatpush.bf16.msrb.mxu2 %v692_v15  ;;  %552 = vmatpush.bf16.msrb.mxu1 %v696_v36 }
   0xe   :  { %94 = vmatpush.bf16.msra.mxu0 %v685_v3  ;;  %394 = vmatpush.bf16.msrb.mxu3 %v694_v35 }
  0x11   :  { %626 = vmatmul.msk.bf16.vlgmr.msra.gmra.mxu0 %vm77_vm0, %v42_v6  ;;  %309 = vmatpush.bf16.msrb.mxu2 %v691_v17 }
  0x12   :  { %395 = vmatpush.bf16.msrb.mxu3 %v693_v39  ;;  %553 = vmatpush.bf16.msrb.mxu1 %v695_v40 }
  0x21   :  { %627 = vmatmul.msk.bf16.gmra.mxu0 %vm77_vm0, %v43_v9 }
  0x31   :  { %628 = vmatmul.msk.bf16.gmra.mxu0 %vm77_vm0, %v44_v12 }
  0x8e   :  { %v847_v16 = vpop.f32.mrf.mxu0 }
  0x96   :  { %v852_v18 = vpop.f32.mrf.mxu0 }
  0x97   :  { %v111_v19 = vpack.c.bf16 %v852_v18, %v847_v16 }
  0x99   :  { %637 = vmatmul.msk.bf16.vlgmr.msra.gmra.mxu1 %vm134_vm1, %v111_v19 }
  0x9e   :  { %v857_v20 = vpop.f32.mrf.mxu0 }
  0xa6   :  { %v859_v21 = vpop.f32.mrf.mxu0 }
  0xa7   :  { %v112_v22 = vpack.c.bf16 %v859_v21, %v857_v20 }
  0xa9   :  { %638 = vmatmul.msk.bf16.vlgmr.msra.gmra.mxu2 %vm134_vm1, %v112_v22 }
  0xae   :  { %v864_v23 = vpop.f32.mrf.mxu0 }
  0xb6   :  { %v866_v24 = vpop.f32.mrf.mxu0 }
  0xb7   :  { %v113_v25 = vpack.c.bf16 %v866_v24, %v864_v23 }
  0xb9   :  { %639 = vmatmul.msk.bf16.vlgmr.msra.gmra.mxu3 %vm134_vm1, %v113_v25  ;;  %654 = vmatmul.msk.bf16.vlgmr.msrb.gmra.mxu2 %vm134_vm1, %v111_v19 }
  0xc9   :  { %655 = vmatmul.msk.bf16.gmra.mxu2 %vm134_vm1, %v112_v22 }
  0xd9   :  { %656 = vmatmul.msk.bf16.gmra.mxu2 %vm134_vm1, %v113_v25 }
 0x116   :  { %v153_v27 = vpop.f32.mrf.mxu1 }
 0x117   :  { %v154_v28 = vadd.f32 %v877_v26, %v153_v27 }
 0x119   :  { %v640_v29 = vmul.f32 -1.442695, %v154_v28 }
 0x11b   :  { %705 = vpow2.f32 %v640_v29 }
 0x11e   :  { %v155_v30 = vpop.f32.mrf.mxu1 }
 0x11f   :  { %v156_v31 = vadd.f32 %v877_v26, %v155_v30 }
 0x121   :  { %v706_v32 = vpop.eup %705  ;;  %v641_v33 = vmul.f32 -1.442695, %v156_v31 }
 0x122   :  { %v186_v34 = vadd.f32 1.0, %v706_v32 }
 0x123   :  { %707 = vpow2.f32 %v641_v33 }
 0x124   :  { %709 = vrcp.f32 %v186_v34  ;;  %v203_v58 = vand.u32 2147483648, %v186_v34  ;;  %vm197_vm4 = vweird.f32 %v186_v34  ;;  %v201_v62 = vand.u32 2147483647, %v186_v34 }
 0x126   :  { %v204_v8 = vor.u32 1.1754944e-38, %v203_v58  ;;  %vm202_vm8 = vcmp.eq.f32.partialorder %v201_v62, 8.507059e+37 }
 0x129   :  { %v708_v37 = vpop.eup %707 }
 0x12a   :  { %v187_v38 = vadd.f32 1.0, %v708_v37  ;;  %v710_v41 = vpop.eup %709 }
 0x12b   :  { %v193_v44 = vmul.f32 %v710_v41, %v186_v34  ;;  %vm198_vm2 = vweird.f32 %v710_v41 }
 0x12c   :  { %711 = vrcp.f32 %v187_v38  ;;  %v158_v42 = vpop.f32.mrf.mxu2  ;;  %v218_v0 = vand.u32 2147483648, %v187_v38  ;;  %vm904_vm5 = vmor %vm197_vm4, %vm198_vm2  ;;  %vm212_vm6 = vweird.f32 %v187_v38  ;;  %v216_v3 = vand.u32 2147483647, %v187_v38 }
 0x12d   :  { %v159_v43 = vadd.f32 %v877_v26, %v158_v42  ;;  %v194_v47 = vsub.f32 1.0, %v193_v44 }
 0x12e   :  { %v219_v13 = vor.u32 1.1754944e-38, %v218_v0  ;;  %vm217_vm9 = vcmp.eq.f32.partialorder %v216_v3, 8.507059e+37 }
 0x12f   :  { %v642_v45 = vmul.f32 -1.442695, %v159_v43  ;;  %v195_v52 = vmul.f32 %v710_v41, %v194_v47 }
 0x131   :  { %713 = vpow2.f32 %v642_v45  ;;  %v196_v57 = vadd.f32 %v710_v41, %v195_v52 }
 0x132   :  { %v712_v46 = vpop.eup %711 }
 0x133   :  { %v208_v48 = vmul.f32 %v712_v46, %v187_v38  ;;  %vm213_vm3 = vweird.f32 %v712_v46  ;;  %v200_v4 = vsel %vm904_vm5, %v710_v41, %v196_v57 }
 0x134   :  { %v160_v49 = vpop.f32.mrf.mxu2  ;;  %vm910_vm7 = vmor %vm212_vm6, %vm213_vm3  ;;  %v205_v14 = vsel %vm202_vm8, %v204_v8, %v200_v4 }
 0x135   :  { %v161_v50 = vadd.f32 %v877_v26, %v160_v49  ;;  %v209_v51 = vsub.f32 1.0, %v208_v48  ;;  %v338_v25 = vsub.f32 1.0, %v205_v14 }
 0x137   :  { %v714_v53 = vpop.eup %713  ;;  %v643_v54 = vmul.f32 -1.442695, %v161_v50  ;;  %v210_v55 = vmul.f32 %v712_v46, %v209_v51  ;;  %v344_v39 = vmul.f32 %v338_v25, %v847_v16 }
 0x138   :  { %v895_v56 = vadd.f32 1.0, %v714_v53 }
 0x139   :  { %715 = vpow2.f32 %v643_v54  ;;  %v211_v60 = vadd.f32 %v712_v46, %v210_v55 }
 0x13a   :  { %717 = vrcp.f32 %v895_v56  ;;  %vm227_vm11 = vweird.f32 %v895_v56  ;;  %v231_v16 = vand.u32 2147483647, %v895_v56 }
 0x13b   :  { %v215_v10 = vsel %vm910_vm7, %v712_v46, %v211_v60  ;;  %v233_v46 = vand.u32 2147483648, %v895_v56 }
 0x13c   :  { %v163_v61 = vpop.f32.mrf.mxu3  ;;  %v311_v63 = vpop.f32.mrf.mxu2  ;;  %v220_v17 = vsel %vm217_vm9, %v219_v13, %v215_v10  ;;  %vm232_vm0 = vcmp.eq.f32.partialorder %v231_v16, 8.507059e+37 }
 0x13d   :  { %v164_v1 = vadd.f32 %v877_v26, %v163_v61  ;;  %v312_v9 = vadd.f32 %v901_v59, %v311_v63  ;;  %v339_v31 = vsub.f32 1.0, %v220_v17  ;;  %v234_v58 = vor.u32 1.1754944e-38, %v233_v46 }
 0x13f   :  { %v716_v6 = vpop.eup %715  ;;  %v644_v7 = vmul.f32 -1.442695, %v164_v1  ;;  %v326_v19 = vmax.f32 %v312_v9, 0.0  ;;  %v345_v41 = vmul.f32 %v339_v31, %v852_v18 }
 0x140   :  { %v917_v11 = vpop.eup %717  ;;  %v189_v12 = vadd.f32 1.0, %v716_v6 }
 0x141   :  { %719 = vpow2.f32 %v644_v7  ;;  %v223_v15 = vmul.f32 %v917_v11, %v895_v56  ;;  %v332_v33 = vmul.f32 %v326_v19, %v205_v14  ;;  %vm228_vm10 = vweird.f32 %v917_v11 }
 0x142   :  { %721 = vrcp.f32 %v189_v12  ;;  %v248_v18 = vand.u32 2147483648, %v189_v12  ;;  %v246_v50 = vand.u32 2147483647, %v189_v12  ;;  %vm940_vm13 = vmor %vm227_vm11, %vm228_vm10  ;;  %vm242_vm14 = vweird.f32 %v189_v12 }
 0x143   :  { %v224_v22 = vsub.f32 1.0, %v223_v15 }
 0x144   :  { %v165_v27 = vpop.f32.mrf.mxu3  ;;  %v313_v28 = vpop.f32.mrf.mxu2  ;;  %v249_v60 = vor.u32 1.1754944e-38, %v248_v18  ;;  %vm247_vm2 = vcmp.eq.f32.partialorder %v246_v50, 8.507059e+37 }
 0x145   :  { %v166_v29 = vadd.f32 %v877_v26, %v165_v27  ;;  %v314_v30 = vadd.f32 %v901_v59, %v313_v28  ;;  %v225_v36 = vmul.f32 %v917_v11, %v224_v22  ;;  %v930_v26 = vadd.f32 %v344_v39, %v332_v33 }
 0x147   :  { %v720_v32 = vpop.eup %719  ;;  %v645_v34 = vmul.f32 -1.442695, %v166_v29  ;;  %v327_v35 = vmax.f32 %v314_v30, 0.0  ;;  %v226_v44 = vadd.f32 %v917_v11, %v225_v36 }
 0x148   :  { %v722_v37 = vpop.eup %721  ;;  %v924_v38 = vadd.f32 1.0, %v720_v32 }
 0x149   :  { %723 = vpow2.f32 %v645_v34  ;;  %v333_v40 = vmul.f32 %v327_v35, %v220_v17  ;;  %v238_v42 = vmul.f32 %v722_v37, %v189_v12  ;;  %vm243_vm12 = vweird.f32 %v722_v37 }
 0x14a   :  { %725 = vrcp.f32 %v924_v38  ;;  %v230_v53 = vsel %vm940_vm13, %v917_v11, %v226_v44  ;;  %vm244_vm15 = vmor %vm242_vm14, %vm243_vm12  ;;  %vm257_vm4 = vweird.f32 %v924_v38  ;;  %v261_v25 = vand.u32 2147483647, %v924_v38 }
 0x14b   :  { %v932_v43 = vadd.f32 %v345_v41, %v333_v40  ;;  %v239_v45 = vsub.f32 1.0, %v238_v42  ;;  %v235_v63 = vsel %vm232_vm0, %v234_v58, %v230_v53  ;;  %v263_v27 = vand.u32 2147483648, %v924_v38 }
 0x14c   :  { %v316_v47 = vpop.f32.mrf.mxu2  ;;  %v340_v4 = vsub.f32 1.0, %v235_v63  ;;  %vm262_vm9 = vcmp.eq.f32.partialorder %v261_v25, 8.507059e+37 }
 0x14d   :  { %v356_v48 = vpack.c.bf16 %v932_v43, %v930_v26  ;;  %v240_v49 = vmul.f32 %v722_v37, %v239_v45  ;;  %v317_v54 = vadd.f32 %v901_v59, %v316_v47  ;;  %v264_v34 = vor.u32 1.1754944e-38, %v263_v27 }
 0x14e   :  { %v346_v11 = vmul.f32 %v340_v4, %v857_v20 }
 0x14f   :  { %v724_v52 = vpop.eup %723  ;;  %665 = vmatmul.msk.bf16.vlgmr.msrb.gmra.mxu3 %vm134_vm1, %v356_v48  ;;  %682 = vmatmul.msk.bf16.vlgmr.msrb.gmra.mxu1 %vm134_vm1, %v356_v48  ;;  %v241_v55 = vadd.f32 %v722_v37, %v240_v49  ;;  %v328_v1 = vmax.f32 %v317_v54, 0.0 }
 0x150   :  { %v726_v56 = vpop.eup %725  ;;  %v191_v57 = vadd.f32 1.0, %v724_v52 }
 0x151   :  { %v245_v61 = vsel %vm244_vm15, %v722_v37, %v241_v55  ;;  %v253_v62 = vmul.f32 %v726_v56, %v924_v38  ;;  %v334_v7 = vmul.f32 %v328_v1, %v235_v63  ;;  %vm258_vm3 = vweird.f32 %v726_v56 }
 0x152   :  { %727 = vrcp.f32 %v191_v57  ;;  %v250_v0 = vsel %vm247_vm2, %v249_v60, %v245_v61  ;;  %v278_v29 = vand.u32 2147483648, %v191_v57  ;;  %v276_v30 = vand.u32 2147483647, %v191_v57  ;;  %vm259_vm6 = vmor %vm257_vm4, %vm258_vm3 }
 0x153   :  { %v254_v2 = vsub.f32 1.0, %v253_v62  ;;  %v341_v6 = vsub.f32 1.0, %v250_v0  ;;  %v954_v15 = vadd.f32 %v346_v11, %v334_v7  ;;  %vm272_vm7 = vweird.f32 %v191_v57 }
 0x154   :  { %v318_v3 = vpop.f32.mrf.mxu2  ;;  %v279_v35 = vor.u32 1.1754944e-38, %v278_v29  ;;  %vm277_vm10 = vcmp.eq.f32.partialorder %v276_v30, 8.507059e+37 }
 0x155   :  { %v319_v5 = vadd.f32 %v901_v59, %v318_v3  ;;  %v255_v9 = vmul.f32 %v726_v56, %v254_v2  ;;  %v347_v13 = vmul.f32 %v341_v6, %v859_v21  ;;  %v988_v2 = vld [vmem:[%s1037_s7] ss:$0 sm:$0xff] }
 0x157   :  { %v329_v8 = vmax.f32 %v319_v5, 0.0  ;;  %v256_v19 = vadd.f32 %v726_v56, %v255_v9 }
 0x158   :  { %v728_v10 = vpop.eup %727 }
 0x159   :  { %v335_v12 = vmul.f32 %v329_v8, %v250_v0  ;;  %v268_v14 = vmul.f32 %v728_v10, %v191_v57  ;;  %vm273_vm5 = vweird.f32 %v728_v10  ;;  %v260_v31 = vsel %vm259_vm6, %v726_v56, %v256_v19 }
 0x15a   :  { %vm274_vm8 = vmor %vm272_vm7, %vm273_vm5  ;;  %v265_v37 = vsel %vm262_vm9, %v264_v34, %v260_v31 }
 0x15b   :  { %v956_v17 = vadd.f32 %v347_v13, %v335_v12  ;;  %v269_v22 = vsub.f32 1.0, %v268_v14  ;;  %v342_v41 = vsub.f32 1.0, %v265_v37 }
 0x15c   :  { %v321_v28 = vpop.f32.mrf.mxu2 }
 0x15d   :  { %v357_v20 = vpack.c.bf16 %v956_v17, %v954_v15  ;;  %v270_v21 = vmul.f32 %v728_v10, %v269_v22  ;;  %v322_v32 = vadd.f32 %v901_v59, %v321_v28  ;;  %v348_v46 = vmul.f32 %v342_v41, %v864_v23 }
 0x15f   :  { %666 = vmatmul.msk.bf16.gmra.mxu3 %vm134_vm1, %v357_v20  ;;  %683 = vmatmul.msk.bf16.gmra.mxu1 %vm134_vm1, %v357_v20  ;;  %v271_v33 = vadd.f32 %v728_v10, %v270_v21  ;;  %v330_v39 = vmax.f32 %v322_v32, 0.0 }
 0x161   :  { %v275_v36 = vsel %vm274_vm8, %v728_v10, %v271_v33  ;;  %v336_v45 = vmul.f32 %v330_v39, %v265_v37 }
 0x162   :  { %v280_v38 = vsel %vm277_vm10, %v279_v35, %v275_v36 }
 0x163   :  { %v343_v44 = vsub.f32 1.0, %v280_v38  ;;  %v969_v48 = vadd.f32 %v348_v46, %v336_v45 }
 0x164   :  { %v323_v40 = vpop.f32.mrf.mxu2 }
 0x165   :  { %v324_v42 = vadd.f32 %v901_v59, %v323_v40  ;;  %v349_v18 = vmul.f32 %v343_v44, %v866_v24  ;;  %v980_v59 = vld [vmem:[%s1040_s9] ss:$0 sm:$0xff] }
 0x167   :  { %v331_v16 = vmax.f32 %v324_v42, 0.0 }
 0x169   :  { %v337_v47 = vmul.f32 %v331_v16, %v280_v38 }
 0x16b   :  { %v971_v49 = vadd.f32 %v349_v18, %v337_v47 }
 0x16d   :  { %v358_v50 = vpack.c.bf16 %v971_v49, %v969_v48 }
 0x16f   :  { %667 = vmatmul.msk.bf16.gmra.mxu3 %vm134_vm1, %v358_v50  ;;  %684 = vmatmul.msk.bf16.gmra.mxu1 %vm134_vm1, %v358_v50 }
 0x1cc   :  { %v555_v57 = vpop.f32.mrf.mxu1 }
 0x1cd   :  { %v556_v11 = vadd.f32 %v988_v2, %v555_v57 }
 0x1cf   :  { %v570_v29 = vmax.f32 %v556_v11, 0.0 }
 0x1d2   :  { %v397_v23 = vpop.f32.mrf.mxu3 }
 0x1d3   :  { %v398_v51 = vadd.f32 %v980_v59, %v397_v23 }
 0x1d4   :  { %v557_v5 = vpop.f32.mrf.mxu1 }
 0x1d5   :  { %v668_v24 = vmul.f32 -1.442695, %v398_v51  ;;  %v558_v37 = vadd.f32 %v988_v2, %v557_v5 }
 0x1d7   :  { %729 = vpow2.f32 %v668_v24  ;;  %v571_v18 = vmax.f32 %v558_v37, 0.0 }
 0x1da   :  { %v399_v52 = vpop.f32.mrf.mxu3 }
 0x1db   :  { %v400_v53 = vadd.f32 %v980_v59, %v399_v52 }
 0x1dc   :  { %v560_v38 = vpop.f32.mrf.mxu1 }
 0x1dd   :  { %v730_v54 = vpop.eup %729  ;;  %v669_v55 = vmul.f32 -1.442695, %v400_v53  ;;  %v561_v57 = vadd.f32 %v988_v2, %v560_v38 }
 0x1de   :  { %v430_v56 = vadd.f32 1.0, %v730_v54 }
 0x1df   :  { %731 = vpow2.f32 %v669_v55  ;;  %v572_v5 = vmax.f32 %v561_v57, 0.0 }
 0x1e0   :  { %733 = vrcp.f32 %v430_v56  ;;  %v447_v4 = vand.u32 2147483648, %v430_v56  ;;  %v445_v8 = vand.u32 2147483647, %v430_v56  ;;  %vm441_vm12 = vweird.f32 %v430_v56 }
 0x1e2   :  { %v402_v58 = vpop.f32.mrf.mxu3  ;;  %v448_v19 = vor.u32 1.1754944e-38, %v447_v4  ;;  %vm446_vm14 = vcmp.eq.f32.partialorder %v445_v8, 8.507059e+37 }
 0x1e3   :  { %v403_v60 = vadd.f32 %v980_v59, %v402_v58 }
 0x1e5   :  { %v732_v61 = vpop.eup %731  ;;  %v670_v62 = vmul.f32 -1.442695, %v403_v60 }
 0x1e6   :  { %v734_v63 = vpop.eup %733  ;;  %v431_v0 = vadd.f32 1.0, %v732_v61 }
 0x1e7   :  { %v437_v1 = vmul.f32 %v734_v63, %v430_v56  ;;  %735 = vpow2.f32 %v670_v62  ;;  %vm442_vm11 = vweird.f32 %v734_v63 }
 0x1e8   :  { %737 = vrcp.f32 %v431_v0  ;;  %vm443_vm13 = vmor %vm441_vm12, %vm442_vm11  ;;  %v460_v30 = vand.u32 2147483647, %v431_v0  ;;  %v462_v31 = vand.u32 2147483648, %v431_v0  ;;  %vm456_vm0 = vweird.f32 %v431_v0 }
 0x1e9   :  { %v438_v3 = vsub.f32 1.0, %v437_v1  ;;  %v562_v1 = vpop.f32.mrf.mxu1 }
 0x1ea   :  { %v404_v6 = vpop.f32.mrf.mxu3  ;;  %v463_v45 = vor.u32 1.1754944e-38, %v462_v31  ;;  %vm461_vm3 = vcmp.eq.f32.partialorder %v460_v30, 8.507059e+37 }
 0x1eb   :  { %v439_v7 = vmul.f32 %v734_v63, %v438_v3  ;;  %v405_v9 = vadd.f32 %v980_v59, %v404_v6 }
 0x1ed   :  { %v736_v10 = vpop.eup %735  ;;  %v440_v12 = vadd.f32 %v734_v63, %v439_v7  ;;  %v671_v13 = vmul.f32 -1.442695, %v405_v9 }
 0x1ee   :  { %v738_v14 = vpop.eup %737  ;;  %v432_v22 = vadd.f32 1.0, %v736_v10 }
 0x1ef   :  { %v444_v25 = vsel %vm443_vm13, %v734_v63, %v440_v12  ;;  %v452_v27 = vmul.f32 %v738_v14, %v431_v0  ;;  %739 = vpow2.f32 %v671_v13  ;;  %vm457_vm15 = vweird.f32 %v738_v14 }
 0x1f0   :  { %v449_v28 = vsel %vm446_vm14, %v448_v19, %v444_v25  ;;  %741 = vrcp.f32 %v432_v22  ;;  %vm458_vm2 = vmor %vm456_vm0, %vm457_vm15  ;;  %v475_v51 = vand.u32 2147483647, %v432_v22  ;;  %v477_v24 = vand.u32 2147483648, %v432_v22 }
 0x1f1   :  { %v582_v20 = vsub.f32 1.0, %v449_v28  ;;  %v453_v21 = vsub.f32 1.0, %v452_v27  ;;  %v576_v33 = vmul.f32 %v570_v29, %v449_v28  ;;  %vm471_vm5 = vweird.f32 %v432_v22 }
 0x1f2   :  { %v407_v32 = vpop.f32.mrf.mxu3  ;;  %v478_v0 = vor.u32 1.1754944e-38, %v477_v24  ;;  %vm476_vm7 = vcmp.eq.f32.partialorder %v475_v51, 8.507059e+37  ;;  %v563_v19 = vadd.f32 %v988_v2, %v562_v1 }
 0x1f3   :  { %v588_v34 = vmul.f32 %v582_v20, %v930_v26  ;;  %v454_v35 = vmul.f32 %v738_v14, %v453_v21  ;;  %v408_v36 = vadd.f32 %v980_v59, %v407_v32  ;;  %v565_v21 = vpop.f32.mrf.mxu1 }
 0x1f4   :  { %v573_v30 = vmax.f32 %v563_v19, 0.0 }
 0x1f5   :  { %v740_v39 = vpop.eup %739  ;;  %v594_v40 = vadd.f32 %v588_v34, %v576_v33  ;;  %v455_v41 = vadd.f32 %v738_v14, %v454_v35  ;;  %v672_v42 = vmul.f32 -1.442695, %v408_v36 }
 0x1f6   :  { %v742_v44 = vpop.eup %741  ;;  %v433_v16 = vadd.f32 1.0, %v740_v39  ;;  %v566_v39 = vadd.f32 %v988_v2, %v565_v21 }
 0x1f7   :  { %600 = vst.msk [vmem:[%s1041_s10] sm:$0xff] %vm134_vm1, %v594_v40  ;;  %v459_v26 = vsel %vm458_vm2, %v738_v14, %v455_v41  ;;  %v467_v46 = vmul.f32 %v742_v44, %v432_v22  ;;  %743 = vpow2.f32 %v672_v42  ;;  %vm472_vm4 = vweird.f32 %v742_v44 }
 0x1f8   :  { %v464_v47 = vsel %vm461_vm3, %v463_v45, %v459_v26  ;;  %745 = vrcp.f32 %v433_v16  ;;  %vm473_vm6 = vmor %vm471_vm5, %vm472_vm4  ;;  %v490_v8 = vand.u32 2147483647, %v433_v16  ;;  %v492_v9 = vand.u32 2147483648, %v433_v16 }
 0x1f9   :  { %v583_v50 = vsub.f32 1.0, %v464_v47  ;;  %v468_v23 = vsub.f32 1.0, %v467_v46  ;;  %v577_v53 = vmul.f32 %v571_v18, %v464_v47  ;;  %vm486_vm9 = vweird.f32 %v433_v16 }
 0x1fa   :  { %v409_v52 = vpop.f32.mrf.mxu3  ;;  %v493_v27 = vor.u32 1.1754944e-38, %v492_v9  ;;  %vm491_vm11 = vcmp.eq.f32.partialorder %v490_v8, 8.507059e+37 }
 0x1fb   :  { %v589_v54 = vmul.f32 %v583_v50, %v932_v43  ;;  %v469_v55 = vmul.f32 %v742_v44, %v468_v23  ;;  %v410_v56 = vadd.f32 %v980_v59, %v409_v52  ;;  %v567_v47 = vpop.f32.mrf.mxu1 }
 0x1fd   :  { %v744_v58 = vpop.eup %743  ;;  %v595_v60 = vadd.f32 %v589_v54, %v577_v53  ;;  %v470_v61 = vadd.f32 %v742_v44, %v469_v55  ;;  %v673_v62 = vmul.f32 -1.442695, %v410_v56  ;;  %v568_v53 = vadd.f32 %v988_v2, %v567_v47 }
 0x1fe   :  { %v746_v63 = vpop.eup %745  ;;  %v434_v3 = vadd.f32 1.0, %v744_v58 }
 0x1ff   :  { %601 = vst.msk [vmem:[%s1041_s10 + $0x8] sm:$0xff] %vm134_vm1, %v595_v60  ;;  %v474_v43 = vsel %vm473_vm6, %v742_v44, %v470_v61  ;;  %v482_v59 = vmul.f32 %v746_v63, %v433_v16  ;;  %747 = vpow2.f32 %v673_v62  ;;  %vm487_vm8 = vweird.f32 %v746_v63 }
 0x200   :  { %v479_v4 = vsel %vm476_vm7, %v478_v0, %v474_v43  ;;  %749 = vrcp.f32 %v434_v3  ;;  %vm488_vm10 = vmor %vm486_vm9, %vm487_vm8  ;;  %v505_v33 = vand.u32 2147483647, %v434_v3  ;;  %v507_v34 = vand.u32 2147483648, %v434_v3 }
 0x201   :  { %v584_v6 = vsub.f32 1.0, %v479_v4  ;;  %v483_v7 = vsub.f32 1.0, %v482_v59  ;;  %v578_v10 = vmul.f32 %v572_v5, %v479_v4  ;;  %vm501_vm13 = vweird.f32 %v434_v3 }
 0x202   :  { %v508_v42 = vor.u32 1.1754944e-38, %v507_v34  ;;  %vm506_vm15 = vcmp.eq.f32.partialorder %v505_v33, 8.507059e+37  ;;  %v575_v58 = vmax.f32 %v568_v53, 0.0 }
 0x203   :  { %v590_v11 = vmul.f32 %v584_v6, %v954_v15  ;;  %v484_v12 = vmul.f32 %v746_v63, %v483_v7 }
 0x205   :  { %v748_v13 = vpop.eup %747  ;;  %v596_v14 = vadd.f32 %v590_v11, %v578_v10  ;;  %v485_v22 = vadd.f32 %v746_v63, %v484_v12 }
 0x206   :  { %v750_v25 = vpop.eup %749  ;;  %v435_v28 = vadd.f32 1.0, %v748_v13 }
 0x207   :  { %602 = vst.msk [vmem:[%s1041_s10 + $0x10] sm:$0xff] %vm134_vm1, %v596_v14  ;;  %v489_v29 = vsel %vm488_vm10, %v746_v63, %v485_v22  ;;  %v497_v15 = vmul.f32 %v750_v25, %v434_v3  ;;  %vm502_vm12 = vweird.f32 %v750_v25 }
 0x208   :  { %v494_v20 = vsel %vm491_vm11, %v493_v27, %v489_v29  ;;  %751 = vrcp.f32 %v435_v28  ;;  %vm503_vm14 = vmor %vm501_vm13, %vm502_vm12  ;;  %v520_v18 = vand.u32 2147483647, %v435_v28  ;;  %v522_v50 = vand.u32 2147483648, %v435_v28 }
 0x209   :  { %v585_v31 = vsub.f32 1.0, %v494_v20  ;;  %v498_v32 = vsub.f32 1.0, %v497_v15  ;;  %v579_v35 = vmul.f32 %v573_v30, %v494_v20  ;;  %vm516_vm2 = vweird.f32 %v435_v28 }
 0x20a   :  { %v523_v55 = vor.u32 1.1754944e-38, %v522_v50  ;;  %vm521_vm4 = vcmp.eq.f32.partialorder %v520_v18, 8.507059e+37 }
 0x20b   :  { %v591_v36 = vmul.f32 %v585_v31, %v956_v17  ;;  %v499_v37 = vmul.f32 %v750_v25, %v498_v32  ;;  %v574_v17 = vmax.f32 %v566_v39, 0.0 }
 0x20d   :  { %v597_v38 = vadd.f32 %v591_v36, %v579_v35  ;;  %v500_v40 = vadd.f32 %v750_v25, %v499_v37 }
 0x20e   :  { %v752_v41 = vpop.eup %751 }
 0x20f   :  { %603 = vst.msk [vmem:[%s1041_s10 + $0x18] sm:$0xff] %vm134_vm1, %v597_v38  ;;  %v504_v44 = vsel %vm503_vm14, %v750_v25, %v500_v40  ;;  %v512_v45 = vmul.f32 %v752_v41, %v435_v28  ;;  %vm517_vm0 = vweird.f32 %v752_v41 }
 0x210   :  { %v509_v16 = vsel %vm506_vm15, %v508_v42, %v504_v44  ;;  %vm518_vm3 = vmor %vm516_vm2, %vm517_vm0 }
 0x211   :  { %v586_v26 = vsub.f32 1.0, %v509_v16  ;;  %v513_v46 = vsub.f32 1.0, %v512_v45  ;;  %v580_v23 = vmul.f32 %v574_v17, %v509_v16 }
 0x213   :  { %v592_v51 = vmul.f32 %v586_v26, %v969_v48  ;;  %v514_v24 = vmul.f32 %v752_v41, %v513_v46 }
 0x215   :  { %v598_v52 = vadd.f32 %v592_v51, %v580_v23  ;;  %v515_v54 = vadd.f32 %v752_v41, %v514_v24 }
 0x217   :  { %604 = vst.msk [vmem:[%s1041_s10 + $0x20] sm:$0xff] %vm134_vm1, %v598_v52  ;;  %v519_v56 = vsel %vm518_vm3, %v752_v41, %v515_v54 }
 0x218   :  { %v524_v57 = vsel %vm521_vm4, %v523_v55, %v519_v56 }
 0x219   :  { %v587_v60 = vsub.f32 1.0, %v524_v57  ;;  %v581_v48 = vmul.f32 %v575_v58, %v524_v57 }
 0x21b   :  { %v593_v61 = vmul.f32 %v587_v60, %v971_v49 }
 0x21d   :  { %v599_v62 = vadd.f32 %v593_v61, %v581_v48 }
 0x21f   :  { %605 = vst.msk [vmem:[%s1041_s10 + $0x28] sm:$0xff] %vm134_vm1, %v599_v62 }

// kernel: forward.4
= control target key start
LH: loop header
LB: loop body
LE: loop exit
PB: predicated region body
PF: predicated region fallthrough
CT: control target
= control target key end

     0   :  { %v917_v23 = vmov 0   ;;  %vm129_vm0 = vcmask 261120   ;;  %vm224_vm1 = vcmask 1043456   ;;  %vm333_vm3 = vcmask 257024   ;;  %s1387_s2 = inlined_call_operand.vmem [shape: bf16[32,256], index: 2, kind: input, shape index: {}]   ;;  %s1388_s6 = inlined_call_operand.vmem [shape: f32[16,4,64], index: 6, kind: output, shape index: {}]   ;;  %s1389_s0 = inlined_call_operand.vmem [shape: f32[16,4,32], index: 0, kind: input, shape index: {}]   ;;  %s1390_s1 = inlined_call_operand.vmem [shape: s32[4,1], index: 1, kind: input, shape index: {}]   ;;  %s1391_s5 = inlined_call_operand.vmem [shape: f32[1,256], index: 5, kind: input, shape index: {}]   ;;  %s1392_s3 = inlined_call_operand.vmem [shape: bf16[32,128], index: 3, kind: input, shape index: {}]   ;;  %s1393_s4 = inlined_call_operand.vmem [shape: bf16[32,128], index: 4, kind: input, shape index: {}]  }
   0x1   :  { %v802_v0 = vld [vmem:[%s1387_s2 + $0x14] sm:$0xf]  ;;  %v746_v1 = vld [vmem:[%s1387_s2 + $0x18] sm:$0xf0]  ;;  %v744_v2 = vld [vmem:[%s1387_s2 + $0x10] sm:$0xf]  ;;  %860 = vset.pattern.permute.xlu0 %v917_v23 }
   0x2   :  { %v749_v3 = vor.u32 %v802_v0, %v746_v1  ;;  %v803_v4 = vld [vmem:[%s1387_s2 + $0x14] sm:$0xf0]  ;;  %v800_v5 = vld [vmem:[%s1387_s2 + $0x4] sm:$0xf]  ;;  %v738_v6 = vld [vmem:[%s1387_s2 + $0x8] sm:$0xf0] }
   0x3   :  { %v745_v7 = vor.u32 %v803_v4, %v744_v2  ;;  %v736_v8 = vld [vmem:[%s1387_s2] sm:$0xf]  ;;  %v801_v9 = vld [vmem:[%s1387_s2 + $0x4] sm:$0xf0]  ;;  %v741_v11 = vor.u32 %v800_v5, %v738_v6  ;;  %v25_v12 = vld [vmem:[%s1389_s0 + $0x4] sm:$0xf] }
   0x4   :  { %v24_v10 = vld [vmem:[%s1389_s0] sm:$0xf]  ;;  %177 = vmatpush.bf16.msra.mxu1 %v749_v3  ;;  %812 = vmatpush.bf16.msra.mxu3 %v749_v3  ;;  %v737_v13 = vor.u32 %v801_v9, %v736_v8  ;;  %v26_v14 = vld [vmem:[%s1389_s0 + $0x8] sm:$0xf]  ;;  %v27_v15 = vld [vmem:[%s1389_s0 + $0xc] sm:$0xf] }
   0x5   :  { %148 = vmatpush.bf16.msra.mxu0 %v745_v7  ;;  %810 = vmatpush.bf16.msra.mxu2 %v745_v7  ;;  %56 = vst [vmem:[#allocation1] ss:$2 sm:$0xff] %v24_v10  ;;  %v28_v16 = vld [vmem:[%s1389_s0 + $0x10] sm:$0xf]  ;;  %v29_v17 = vld [vmem:[%s1389_s0 + $0x14] sm:$0xf] }
   0x6   :  { %58 = vst [vmem:[#allocation1 + $0x1] ss:$2 sm:$0xff] %v25_v12  ;;  %v30_v18 = vld [vmem:[%s1389_s0 + $0x18] sm:$0xf]  ;;  %v31_v19 = vld [vmem:[%s1389_s0 + $0x1c] sm:$0xf] }
   0x7   :  { %60 = vst [vmem:[#allocation1 + $0x10] ss:$2 sm:$0xff] %v26_v14  ;;  %v32_v20 = vld [vmem:[%s1389_s0 + $0x20] sm:$0xf]  ;;  %v33_v22 = vld [vmem:[%s1389_s0 + $0x24] sm:$0xf] }
   0x8   :  { %178 = vmatpush.bf16.msra.mxu1 %v741_v11  ;;  %813 = vmatpush.bf16.msra.mxu3 %v741_v11  ;;  %62 = vst [vmem:[#allocation1 + $0x11] ss:$2 sm:$0xff] %v27_v15  ;;  %v281_v21 = vld [vmem:[%s1390_s1] sm:$0xf]  ;;  %v34_v24 = vld [vmem:[%s1389_s0 + $0x28] sm:$0xf] }
   0x9   :  { %149 = vmatpush.bf16.msra.mxu0 %v737_v13  ;;  %811 = vmatpush.bf16.msra.mxu2 %v737_v13  ;;  %64 = vst [vmem:[#allocation1 + $0x20] ss:$2 sm:$0xff] %v28_v16  ;;  %v35_v26 = vld [vmem:[%s1389_s0 + $0x2c] sm:$0xf]  ;;  %v36_v27 = vld [vmem:[%s1389_s0 + $0x30] sm:$0xf] }
   0xa   :  { %66 = vst [vmem:[#allocation1 + $0x21] ss:$2 sm:$0xff] %v29_v17  ;;  %283 = vperm.xlu0 %860, %v281_v21   ;;  %v37_v30 = vld [vmem:[%s1389_s0 + $0x34] sm:$0xf]  ;;  %v38_v31 = vld [vmem:[%s1389_s0 + $0x38] sm:$0xf] }
   0xb   :  { %68 = vst [vmem:[#allocation1 + $0x30] ss:$2 sm:$0xff] %v30_v18  ;;  %v39_v33 = vld [vmem:[%s1389_s0 + $0x3c] sm:$0xf]  ;;  %v103_v42 = vld [vmem:[%s1391_s5] sm:$0x3] }
   0xc   :  { %70 = vst [vmem:[#allocation1 + $0x31] ss:$2 sm:$0xff] %v31_v19  ;;  %v1044_v43 = vperm.slane %v103_v42, 1  ;;  %v1046_v44 = vperm.slane %v103_v42, 0  ;;  %v1061_v0 = vld [vmem:[%s1392_s3] sm:$0xf] }
   0xd   :  { %v71_v25 = vld.sshfl [vmem:[#allocation1] sm:$0xff pattern:$0x75316420]  ;;  %v1076_v8 = vld [vmem:[%s1392_s3 + $0x8] sm:$0xf]  ;;  %v918_v13 = vmov 0.0  }
   0xe   :  { %75 = vst [vmem:[#allocation1] ss:$2 sm:$0xff] %v32_v20  ;;  %v1069_v5 = vld [vmem:[%s1392_s3] sm:$0xf0]  ;;  %v1081_v9 = vld [vmem:[%s1392_s3 + $0x8] sm:$0xf0] }
   0xf   :  { %v72_v28 = vld.sshfl [vmem:[#allocation1 + $0x10] sm:$0xff pattern:$0x75316420]  ;;  %76 = vst [vmem:[#allocation1 + $0x1] ss:$2 sm:$0xff] %v33_v22 }
  0x10   :  { %77 = vst [vmem:[#allocation1 + $0x10] ss:$2 sm:$0xff] %v34_v24  ;;  %v95_v29 = vpack.c.bf16 %v72_v28, %v71_v25  ;;  %v1086_v11 = vld [vmem:[%s1393_s4] sm:$0xf]  ;;  %v1093_v15 = vld [vmem:[%s1393_s4] sm:$0xf0] }
  0x11   :  { %78 = vst [vmem:[#allocation1 + $0x11] ss:$2 sm:$0xff] %v35_v26  ;;  %v73_v32 = vld.sshfl [vmem:[#allocation1 + $0x20] sm:$0xff pattern:$0x75316420] }
  0x12   :  { %754 = vmatmul.msk.bf16.vlgmr.msra.gmra.mxu1 %vm129_vm0, %v95_v29  ;;  %750 = vmatmul.msk.bf16.vlgmr.msra.gmra.mxu0 %vm129_vm0, %v95_v29  ;;  %79 = vst [vmem:[#allocation1 + $0x20] ss:$2 sm:$0xff] %v36_v27  ;;  %v1102_v18 = vld [vmem:[%s1393_s4 + $0x8] sm:$0xf]  ;;  %v1110_v22 = vld [vmem:[%s1393_s4 + $0x8] sm:$0xf0] }
  0x13   :  { %v74_v34 = vld.sshfl [vmem:[#allocation1 + $0x30] sm:$0xff pattern:$0x75316420]  ;;  %80 = vst [vmem:[#allocation1 + $0x21] ss:$2 sm:$0xff] %v37_v30  ;;  %s1182_s4 = smov 0  }
  0x14   :  { %81 = vst [vmem:[#allocation1 + $0x30] ss:$2 sm:$0xff] %v38_v31  ;;  %v96_v38 = vpack.c.bf16 %v74_v34, %v73_v32 }
  0x15   :  { %82 = vst [vmem:[#allocation1 + $0x31] ss:$2 sm:$0xff] %v39_v33 }
  0x16   :  { %v83_v35 = vld.sshfl [vmem:[#allocation1] sm:$0xff pattern:$0x75316420] }
  0x18   :  { %v84_v36 = vld.sshfl [vmem:[#allocation1 + $0x10] sm:$0xff pattern:$0x75316420] }
  0x19   :  { %v97_v37 = vpack.c.bf16 %v84_v36, %v83_v35 }
  0x1a   :  { %v85_v39 = vld.sshfl [vmem:[#allocation1 + $0x20] sm:$0xff pattern:$0x75316420] }
  0x1b   :  { %752 = vmatmul.msk.bf16.vlgmr.msra.gmra.mxu2 %vm129_vm0, %v97_v37  ;;  %756 = vmatmul.msk.bf16.vlgmr.msra.gmra.mxu3 %vm129_vm0, %v97_v37 }
  0x1c   :  { %v86_v40 = vld.sshfl [vmem:[#allocation1 + $0x30] sm:$0xff pattern:$0x75316420] }
  0x1d   :  { %v98_v41 = vpack.c.bf16 %v86_v40, %v85_v39 }
  0x22   :  { %755 = vmatmul.msk.bf16.gmra.mxu1 %vm129_vm0, %v96_v38  ;;  %751 = vmatmul.msk.bf16.gmra.mxu0 %vm129_vm0, %v96_v38 }
  0x2b   :  { %753 = vmatmul.msk.bf16.gmra.mxu2 %vm129_vm0, %v98_v41  ;;  %757 = vmatmul.msk.bf16.gmra.mxu3 %vm129_vm0, %v98_v41 }
  0x7c   :  { %v1056_v60 = vpop.permute.xlu0 %283 }
  0x7d   :  { %vm285_vm2 = vcmp.gt.s32.totalorder %v1056_v60, 0  ;;  %vm286_vm4 = vcmp.gt.s32.totalorder %v1056_v60, 1  ;;  %vm287_vm5 = vcmp.gt.s32.totalorder %v1056_v60, 2  ;;  %vm288_vm6 = vcmp.gt.s32.totalorder %v1056_v60, 3 }
  0x7e   :  { %v758_v14 = vsel %vm285_vm2, 1.0, %v918_v13  ;;  %vm289_vm7 = vcmp.gt.s32.totalorder %v1056_v60, 4  ;;  %v759_v24 = vsel %vm286_vm4, 1.0, %v918_v13  ;;  %v760_v27 = vsel %vm287_vm5, 1.0, %v918_v13 }
  0x7f   :  { %334 = vst.msk [vmem:[#allocation3] sm:$0xf] %vm333_vm3, %v758_v14  ;;  %v761_v31 = vsel %vm288_vm6, 1.0, %v918_v13  ;;  %v762_v34 = vsel %vm289_vm7, 1.0, %v918_v13  ;;  %vm290_vm8 = vcmp.gt.s32.totalorder %v1056_v60, 5  ;;  %vm291_vm9 = vcmp.gt.s32.totalorder %v1056_v60, 6 }
  0x80   :  { %335 = vst.msk [vmem:[#allocation3 + $0x4] sm:$0xf] %vm333_vm3, %v759_v24  ;;  %vm292_vm10 = vcmp.gt.s32.totalorder %v1056_v60, 7  ;;  %vm293_vm11 = vcmp.gt.s32.totalorder %v1056_v60, 8  ;;  %vm294_vm12 = vcmp.gt.s32.totalorder %v1056_v60, 9  ;;  %vm295_vm13 = vcmp.gt.s32.totalorder %v1056_v60, 10 }
  0x81   :  { %336 = vst.msk [vmem:[#allocation3 + $0x8] sm:$0xf] %vm333_vm3, %v760_v27  ;;  %vm296_vm14 = vcmp.gt.s32.totalorder %v1056_v60, 11  ;;  %vm297_vm15 = vcmp.gt.s32.totalorder %v1056_v60, 12  ;;  %vm298_vm2 = vcmp.gt.s32.totalorder %v1056_v60, 13  ;;  %vm299_vm4 = vcmp.gt.s32.totalorder %v1056_v60, 14 }
  0x82   :  { %337 = vst.msk [vmem:[#allocation3 + $0xc] sm:$0xf] %vm333_vm3, %v761_v31  ;;  %vm300_vm5 = vcmp.gt.s32.totalorder %v1056_v60, 15  ;;  %v1174_v14 = vmov 0.0  }
  0x83   :  { %338 = vst.msk [vmem:[#allocation3 + $0x10] sm:$0xf] %vm333_vm3, %v762_v34 }
  0x8f   :  { %v180_v45 = vpop.f32.mrf.mxu1  ;;  %v151_v46 = vpop.f32.mrf.mxu0 }
  0x90   :  { %v181_v47 = vadd.f32 %v180_v45, %v1044_v43  ;;  %v152_v48 = vadd.f32 %v151_v46, %v1046_v44  ;;  %v763_v46 = vsel %vm290_vm8, 1.0, %v918_v13 }
  0x91   :  { %339 = vst.msk [vmem:[#allocation3 + $0x14] sm:$0xf] %vm333_vm3, %v763_v46 }
  0x92   :  { %v216_v49 = vrot.slane %v181_v47, 4 }
  0x94   :  { %v225_v50 = vsel %vm224_vm1, %v152_v48, %v216_v49  ;;  %v226_v51 = vsel %vm224_vm1, %v216_v49, %v152_v48  ;;  %v764_v49 = vsel %vm291_vm9, 1.0, %v918_v13 }
  0x95   :  { %v227_v52 = vrot.slane %v226_v51, 4  ;;  %265 = vst [vmem:[#allocation2] sm:$0xff] %v225_v50 }
  0x96   :  { %340 = vst.msk [vmem:[#allocation3 + $0x18] sm:$0xf] %vm333_vm3, %v764_v49 }
  0x97   :  { %266 = vst [vmem:[#allocation2 + $0x8] sm:$0xff] %v227_v52  ;;  %v182_v53 = vpop.f32.mrf.mxu1  ;;  %v153_v54 = vpop.f32.mrf.mxu0  ;;  %v765_v52 = vsel %vm292_vm10, 1.0, %v918_v13 }
  0x98   :  { %v183_v55 = vadd.f32 %v182_v53, %v1044_v43  ;;  %v154_v56 = vadd.f32 %v153_v54, %v1046_v44  ;;  %v766_v53 = vsel %vm293_vm11, 1.0, %v918_v13  ;;  %341 = vst.msk [vmem:[#allocation3 + $0x1c] sm:$0xf] %vm333_vm3, %v765_v52 }
  0x99   :  { %342 = vst.msk [vmem:[#allocation3 + $0x20] sm:$0xf] %vm333_vm3, %v766_v53 }
  0x9a   :  { %v217_v57 = vrot.slane %v183_v55, 4  ;;  %v767_v55 = vsel %vm294_vm12, 1.0, %v918_v13 }
  0x9b   :  { %343 = vst.msk [vmem:[#allocation3 + $0x24] sm:$0xf] %vm333_vm3, %v767_v55 }
  0x9c   :  { %v228_v58 = vsel %vm224_vm1, %v154_v56, %v217_v57  ;;  %v229_v59 = vsel %vm224_vm1, %v217_v57, %v154_v56 }
  0x9d   :  { %v230_v61 = vrot.slane %v229_v59, 4  ;;  %267 = vst [vmem:[#allocation2 + $0x10] sm:$0xff] %v228_v58  ;;  %v768_v59 = vsel %vm295_vm13, 1.0, %v918_v13 }
  0x9e   :  { %v161_v62 = vpop.f32.mrf.mxu2  ;;  %v190_v63 = vpop.f32.mrf.mxu3  ;;  %344 = vst.msk [vmem:[#allocation3 + $0x28] sm:$0xf] %vm333_vm3, %v768_v59 }
  0x9f   :  { %v162_v1 = vadd.f32 %v161_v62, %v1046_v44  ;;  %v191_v2 = vadd.f32 %v190_v63, %v1044_v43  ;;  %268 = vst [vmem:[#allocation2 + $0x18] sm:$0xff] %v230_v61  ;;  %v185_v3 = vpop.f32.mrf.mxu1  ;;  %v156_v4 = vpop.f32.mrf.mxu0  ;;  %v769_v61 = vsel %vm296_vm14, 1.0, %v918_v13 }
  0xa0   :  { %v186_v6 = vadd.f32 %v185_v3, %v1044_v43  ;;  %v157_v7 = vadd.f32 %v156_v4, %v1046_v44  ;;  %v771_v3 = vsel %vm298_vm2, 1.0, %v918_v13  ;;  %v772_v4 = vsel %vm299_vm4, 1.0, %v918_v13  ;;  %345 = vst.msk [vmem:[#allocation3 + $0x2c] sm:$0xf] %vm333_vm3, %v769_v61 }
  0xa1   :  { %v220_v10 = vrot.slane %v191_v2, 4  ;;  %347 = vst.msk [vmem:[#allocation3 + $0x34] sm:$0xf] %vm333_vm3, %v771_v3 }
  0xa2   :  { %v218_v12 = vrot.slane %v186_v6, 4  ;;  %348 = vst.msk [vmem:[#allocation3 + $0x38] sm:$0xf] %vm333_vm3, %v772_v4 }
  0xa3   :  { %v237_v16 = vsel %vm224_vm1, %v162_v1, %v220_v10  ;;  %v238_v17 = vsel %vm224_vm1, %v220_v10, %v162_v1  ;;  %v770_v1 = vsel %vm297_vm15, 1.0, %v918_v13  ;;  %v773_v10 = vsel %vm300_vm5, 1.0, %v918_v13 }
  0xa4   :  { %v239_v19 = vrot.slane %v238_v17, 4  ;;  %273 = vst [vmem:[#allocation2 + $0x40] sm:$0xff] %v237_v16  ;;  %v231_v20 = vsel %vm224_vm1, %v157_v7, %v218_v12  ;;  %v232_v21 = vsel %vm224_vm1, %v218_v12, %v157_v7  ;;  %v1178_v16 = vmov 0.0  }
  0xa5   :  { %v233_v23 = vrot.slane %v232_v21, 4  ;;  %269 = vst [vmem:[#allocation2 + $0x20] sm:$0xff] %v231_v20  ;;  %v1180_v13 = vmov 0.0  }
  0xa6   :  { %274 = vst [vmem:[#allocation2 + $0x48] sm:$0xff] %v239_v19  ;;  %v163_v25 = vpop.f32.mrf.mxu2  ;;  %v192_v26 = vpop.f32.mrf.mxu3 }
  0xa7   :  { %v193_v28 = vadd.f32 %v192_v26, %v1044_v43  ;;  %270 = vst [vmem:[#allocation2 + $0x28] sm:$0xff] %v233_v23  ;;  %v187_v29 = vpop.f32.mrf.mxu1  ;;  %v158_v30 = vpop.f32.mrf.mxu0  ;;  %v164_v35 = vadd.f32 %v163_v25, %v1046_v44 }
  0xa8   :  { %v188_v32 = vadd.f32 %v187_v29, %v1044_v43  ;;  %v159_v33 = vadd.f32 %v158_v30, %v1046_v44  ;;  %346 = vst.msk [vmem:[#allocation3 + $0x30] sm:$0xf] %vm333_vm3, %v770_v1 }
  0xa9   :  { %v221_v36 = vrot.slane %v193_v28, 4  ;;  %349 = vst.msk [vmem:[#allocation3 + $0x3c] sm:$0xf] %vm333_vm3, %v773_v10 }
  0xaa   :  { %v219_v37 = vrot.slane %v188_v32, 4 }
  0xab   :  { %v240_v38 = vsel %vm224_vm1, %v164_v35, %v221_v36  ;;  %v241_v39 = vsel %vm224_vm1, %v221_v36, %v164_v35 }
  0xac   :  { %v242_v40 = vrot.slane %v241_v39, 4  ;;  %275 = vst [vmem:[#allocation2 + $0x50] sm:$0xff] %v240_v38  ;;  %v234_v41 = vsel %vm224_vm1, %v159_v33, %v219_v37  ;;  %v235_v42 = vsel %vm224_vm1, %v219_v37, %v159_v33 }
  0xad   :  { %v236_v45 = vrot.slane %v235_v42, 4  ;;  %271 = vst [vmem:[#allocation2 + $0x30] sm:$0xff] %v234_v41 }
  0xae   :  { %276 = vst [vmem:[#allocation2 + $0x58] sm:$0xff] %v242_v40  ;;  %v166_v47 = vpop.f32.mrf.mxu2  ;;  %v195_v48 = vpop.f32.mrf.mxu3 }
  0xaf   :  { %v167_v50 = vadd.f32 %v166_v47, %v1046_v44  ;;  %v196_v51 = vadd.f32 %v195_v48, %v1044_v43  ;;  %272 = vst [vmem:[#allocation2 + $0x38] sm:$0xff] %v236_v45 }
  0xb1   :  { %v222_v54 = vrot.slane %v196_v51, 4 }
  0xb3   :  { %v243_v56 = vsel %vm224_vm1, %v167_v50, %v222_v54  ;;  %v244_v57 = vsel %vm224_vm1, %v222_v54, %v167_v50 }
  0xb4   :  { %v245_v58 = vrot.slane %v244_v57, 4  ;;  %277 = vst [vmem:[#allocation2 + $0x60] sm:$0xff] %v243_v56 }
  0xb6   :  { %278 = vst [vmem:[#allocation2 + $0x68] sm:$0xff] %v245_v58  ;;  %v168_v62 = vpop.f32.mrf.mxu2  ;;  %v197_v63 = vpop.f32.mrf.mxu3 }
  0xb7   :  { %v198_v2 = vadd.f32 %v197_v63, %v1044_v43  ;;  %v169_v6 = vadd.f32 %v168_v62, %v1046_v44  ;;  %v1176_v44 = vmov 0.0  }
  0xb9   :  { %v223_v7 = vrot.slane %v198_v2, 4 }
  0xbb   :  { %v246_v43 = vsel %vm224_vm1, %v169_v6, %v223_v7  ;;  %v247_v60 = vsel %vm224_vm1, %v223_v7, %v169_v6 }
  0xbc   :  { %v248_v12 = vrot.slane %v247_v60, 4  ;;  %279 = vst [vmem:[#allocation2 + $0x70] sm:$0xff] %v246_v43 }
  0xbe   :  { %280 = vst [vmem:[#allocation2 + $0x78] sm:$0xff] %v248_v12 }
  0xbf LB: > { %v783_v17 = vor.u32 %v1081_v9, %v1076_v8  ;;  %v794_v19 = vor.u32 %v1110_v22, %v1102_v18  ;;  %v779_v20 = vor.u32 %v1069_v5, %v1061_v0  ;;  %s798_s11 = sshll.u32 %s915_s4, 2  ;;  %v790_v21 = vor.u32 %v1093_v15, %v1086_v11  ;;  %s368_s12 = ssub.s32 15, %s915_s4  ;;  %s915_s4 = sphi %s1182_s4, %s363_s4   ;;  %v911_v13 = vphi %v1180_v13, %v537_v13   ;;  %v907_v16 = vphi %v1178_v16, %v546_v16   ;;  %v903_v44 = vphi %v1176_v44, %v556_v44   ;;  %v899_v14 = vphi %v1174_v14, %v565_v14  }
  0xc0   : > { %s1201_s13 = sshll.u32 %s368_s12, 2  ;;  %s919_s14 = smov 32   ;;  %v373_v24 = vpack.c.bf16 %v911_v13, %v911_v13  ;;  %v407_v26 = vpack.c.bf16 %v903_v44, %v903_v44 }
  0xc1   : > { %395 = vmatpush.bf16.msra.mxu0 %v783_v17  ;;  %429 = vmatpush.bf16.msra.mxu1 %v794_v19  ;;  %s523_s1 = scalar_lea.vmem [#allocation3], %s798_s11  ;;  %s526_s15 = scalar_lea.vmem [#allocation3], %s1201_s13 }
  0xc2   : > { %461 = vrot.lane.b32.xlu1 %v907_v16, %s919_s14  ;;  %v1206_v23 = vld [vmem:[%s523_s1] sm:$0xf]  ;;  %502 = vrot.lane.b32.xlu2 %v899_v14, %s919_s14  ;;  %s808_s16 = sshll.u32 %s915_s4, 3  ;;  %s809_s17 = sshll.u32 %s368_s12, 3 }
  0xc3   : > { %v535_v25 = vsub.f32 1.0, %v1206_v23  ;;  %v1211_v27 = vld [vmem:[%s526_s15] sm:$0xf]  ;;  %s371_s18 = scalar_lea.vmem [#allocation2], %s808_s16  ;;  %s405_s19 = scalar_lea.vmem [#allocation2], %s809_s17 }
  0xc4   : > { %v554_v28 = vsub.f32 1.0, %v1211_v27  ;;  %s920_s2 = smov 64   ;;  %s921_s0 = smov 96  }
  0xc5   : > { %396 = vmatpush.bf16.msra.mxu0 %v779_v20  ;;  %430 = vmatpush.bf16.msra.mxu1 %v790_v21  ;;  %v1214_v29 = vmul.f32 %v911_v13, %v535_v25  ;;  %v1216_v30 = vmul.f32 %v907_v16, %v535_v25  ;;  %v372_v33 = vld [vmem:[%s371_s18] sm:$0xff]  ;;  %s567_s20 = scalar_lea.vmem [#allocation4], %s798_s11  ;;  %s570_s5 = scalar_lea.vmem [#allocation5], %s1201_s13 }
  0xc6   : > { %v1218_v31 = vmul.f32 %v903_v44, %v554_v28  ;;  %v1220_v32 = vmul.f32 %v899_v14, %v554_v28  ;;  %v406_v34 = vld [vmem:[%s405_s19] sm:$0xff]  ;;  %s363_s4 = sadd.s32 1, %s915_s4  }
  0xc7   : > { %v437_v38 = vrot.slane %v406_v34, 4  ;;  %p360_p0 = scmp.ge.s32.totalorder %s363_s4, 16  }
  0xc8   : > { %784 = vmatmul.msk.bf16.vlgmr.msra.gmra.mxu0 %vm129_vm0, %v373_v24  ;;  %795 = vmatmul.msk.bf16.vlgmr.msra.gmra.mxu1 %vm129_vm0, %v407_v26  ;;  %s922_s21 = smov (%p360_p0), 32   ;;  %vm684_vm0 = vcmask (%p360_p0), 519424  }
 0x11c   : > { %v503_v13 = vpop.permute.xlu2 %502 }
 0x134   : > { %v462_v21 = vpop.permute.xlu1 %461 }
 0x145   : > { %v398_v35 = vpop.f32.mrf.mxu0  ;;  %v432_v36 = vpop.f32.mrf.mxu1 }
 0x146   : > { %v402_v37 = vadd.f32 %v398_v35, %v372_v33  ;;  %v439_v39 = vadd.f32 %v437_v38, %v432_v36 }
 0x148   : > { %861 = vtanh.f32 %v402_v37  ;;  %v796_v46 = vmul.f32 -1.442695, %v402_v37  ;;  %v797_v47 = vmul.f32 -1.442695, %v439_v39 }
 0x149   : > { %863 = vtanh.f32 %v439_v39 }
 0x14a   : > { %865 = vpow2.f32 %v796_v46 }
 0x14b   : > { %867 = vpow2.f32 %v797_v47 }
 0x14d   : > { %v400_v40 = vpop.f32.mrf.mxu0  ;;  %v434_v41 = vpop.f32.mrf.mxu1 }
 0x14e   : > { %v862_v42 = vpop.eup %861 }
 0x14f   : > { %466 = vrot.lane.b32.xlu0 %v862_v42, %s920_s2  ;;  %v864_v45 = vpop.eup %863 }
 0x150   : > { %v866_v48 = vpop.eup %865 }
 0x151   : > { %v443_v49 = vadd.f32 1.0, %v866_v48  ;;  %v868_v50 = vpop.eup %867 }
 0x152   : > { %v484_v51 = vadd.f32 1.0, %v868_v50 }
 0x153   : > { %869 = vrcp.f32 %v443_v49  ;;  %v455_v61 = vand.u32 2147483648, %v443_v49  ;;  %vm449_vm6 = vweird.f32 %v443_v49  ;;  %v453_v62 = vand.u32 2147483647, %v443_v49 }
 0x154   : > { %871 = vrcp.f32 %v484_v51  ;;  %vm490_vm9 = vweird.f32 %v484_v51  ;;  %v496_v4 = vand.u32 2147483648, %v484_v51  ;;  %v494_v10 = vand.u32 2147483647, %v484_v51 }
 0x155   : > { %v456_v2 = vor.u32 1.1754944e-38, %v455_v61  ;;  %vm454_vm8 = vcmp.eq.f32.partialorder %v453_v62, 8.507059e+37 }
 0x156   : > { %v497_v60 = vor.u32 1.1754944e-38, %v496_v4  ;;  %vm495_vm12 = vcmp.eq.f32.partialorder %v494_v10, 8.507059e+37 }
 0x157   : > { %507 = vrot.lane.b32.xlu0 %v864_v45, %s920_s2 }
 0x159   : > { %v870_v52 = vpop.eup %869 }
 0x15a   : > { %v445_v53 = vmul.f32 %v870_v52, %v443_v49  ;;  %v872_v55 = vpop.eup %871  ;;  %vm450_vm1 = vweird.f32 %v870_v52 }
 0x15b   : > { %v486_v57 = vmul.f32 %v872_v55, %v484_v51  ;;  %vm451_vm7 = vmor %vm449_vm6, %vm450_vm1  ;;  %vm491_vm10 = vweird.f32 %v872_v55 }
 0x15c   : > { %v446_v54 = vsub.f32 1.0, %v445_v53  ;;  %vm492_vm11 = vmor %vm490_vm9, %vm491_vm10 }
 0x15d   : > { %v487_v59 = vsub.f32 1.0, %v486_v57 }
 0x15e   : > { %v447_v56 = vmul.f32 %v870_v52, %v446_v54 }
 0x15f   : > { %v488_v1 = vmul.f32 %v872_v55, %v487_v59 }
 0x160   : > { %v448_v58 = vadd.f32 %v870_v52, %v447_v56 }
 0x161   : > { %v489_v7 = vadd.f32 %v872_v55, %v488_v1 }
 0x162   : > { %v452_v63 = vsel %vm451_vm7, %v870_v52, %v448_v58 }
 0x163   : > { %v457_v3 = vsel %vm454_vm8, %v456_v2, %v452_v63  ;;  %v493_v12 = vsel %vm492_vm11, %v872_v55, %v489_v7 }
 0x164   : > { %v498_v14 = vsel %vm495_vm12, %v497_v60, %v493_v12  ;;  %v464_v25 = vmul.f32 %v462_v21, %v457_v3 }
 0x165   : > { %v505_v17 = vmul.f32 %v503_v13, %v498_v14 }
 0x1c1   : > { %v467_v6 = vpop.permute.xlu0 %466 }
 0x1c2   : > { %v469_v43 = vmul.f32 %v467_v6, %v457_v3 }
 0x1c4   : > { %471 = vrot.lane.b32.xlu1 %v469_v43, %s919_s14 }
 0x1c9   : > { %v508_v44 = vpop.permute.xlu0 %507 }
 0x1ca   : > { %v510_v16 = vmul.f32 %v508_v44, %v498_v14 }
 0x1cc   : > { %512 = vrot.lane.b32.xlu2 %v510_v16, %s919_s14 }
 0x226   : > { %v513_v19 = vpop.permute.xlu2 %512 }
 0x227   : > { %v515_v20 = vadd.f32 %v513_v19, %v505_v17 }
 0x229   : > { %873 = vtanh.f32 %v515_v20 }
 0x22f   : > { %v874_v24 = vpop.eup %873 }
 0x230   : > { %518 = vrot.lane.b32.xlu1 %v874_v24, %s920_s2 }
 0x236   : > { %v472_v26 = vpop.permute.xlu1 %471 }
 0x237   : > { %v474_v28 = vadd.f32 %v472_v26, %v464_v25 }
 0x239   : > { %875 = vtanh.f32 %v474_v28 }
 0x23f   : > { %v876_v33 = vpop.eup %875 }
 0x240   : > { %477 = vrot.lane.b32.xlu0 %v876_v33, %s920_s2 }
 0x2a2   : > { %v519_v37 = vpop.permute.xlu1 %518 }
 0x2a3   : > { %v521_v38 = vmul.f32 %v519_v37, %v498_v14 }
 0x2b2   : > { %v478_v34 = vpop.permute.xlu0 %477 }
 0x2b3   : > { %v480_v35 = vmul.f32 %v478_v34, %v457_v3 }
 0x2b5   : > { %529 = vst [vmem:[#allocation1] ss:$2 sm:$0xff] %v480_v35 }
 0x2bc   : > { %v530_v36 = vld.sshfl [vmem:[#allocation1] sm:$0xff pattern:$0x75316420] }
 0x2bd   : > { %539 = vst [vmem:[#allocation1] ss:$2 sm:$0xff] %v474_v28  ;;  %531 = vrot.lane.b32.xlu2 %v530_v36, %s919_s14 }
 0x2c4   : > { %v540_v39 = vld.sshfl [vmem:[#allocation1] sm:$0xff pattern:$0x75316420] }
 0x2c5   : > { %541 = vrot.lane.b32.xlu1 %v540_v39, %s921_s0  ;;  %548 = vst [vmem:[#allocation1] ss:$2 sm:$0xff] %v521_v38 }
 0x2cc   : > { %v549_v40 = vld.sshfl [vmem:[#allocation1] sm:$0xff pattern:$0x75316420] }
 0x2cd   : > { %550 = vrot.lane.b32.xlu0 %v549_v40, %s919_s14  ;;  %558 = vst [vmem:[#allocation1] ss:$2 sm:$0xff] %v515_v20 }
 0x2d4   : > { %v559_v41 = vld.sshfl [vmem:[#allocation1] sm:$0xff pattern:$0x75316420] }
 0x2d5   : > { %560 = vrot.lane.b32.xlu2 %v559_v41, %s921_s0 }
 0x317   : > { %v532_v42 = vpop.permute.xlu2 %531 }
 0x318   : > { %v534_v45 = vmul.f32 %v532_v42, %v1206_v23 }
 0x31a   : > { %v537_v13 = vadd.f32 %v1214_v29, %v534_v45  }
 0x31c   : > { %v566_v46 = vmul.f32 %v537_v13, %v1206_v23 }
 0x31e   : > { %568 = vst.msk [vmem:[%s567_s20] sm:$0xf] %vm333_vm3, %v566_v46 }
 0x325   :  { %v572_v18 = vld [vmem:[#allocation4] sm:$0xf] (%p360_p0)  ;;  %v576_v22 = vld [vmem:[#allocation4 + $0x10] sm:$0xf] (%p360_p0)  ;;  %v574_v58 = vld [vmem:[#allocation4 + $0x8] sm:$0xf] (%p360_p0) }
 0x326   :  { %588 = vst.msk [vmem:[%s1388_s6] sm:$0xf] (%p360_p0), %vm333_vm3, %v572_v18  ;;  %v573_v59 = vld [vmem:[#allocation4 + $0x4] sm:$0xf] (%p360_p0)  ;;  %v577_v61 = vld [vmem:[#allocation4 + $0x14] sm:$0xf] (%p360_p0) }
 0x327   :  { %592 = vst.msk [vmem:[%s1388_s6 + $0x10] sm:$0xf] (%p360_p0), %vm333_vm3, %v576_v22  ;;  %v575_v62 = vld [vmem:[#allocation4 + $0xc] sm:$0xf] (%p360_p0)  ;;  %v578_v1 = vld [vmem:[#allocation4 + $0x18] sm:$0xf] (%p360_p0) }
 0x328   :  { %590 = vst.msk [vmem:[%s1388_s6 + $0x8] sm:$0xf] (%p360_p0), %vm333_vm3, %v574_v58  ;;  %v580_v2 = vld [vmem:[#allocation4 + $0x20] sm:$0xf] (%p360_p0)  ;;  %v579_v3 = vld [vmem:[#allocation4 + $0x1c] sm:$0xf] (%p360_p0) }
 0x329   :  { %589 = vst.msk [vmem:[%s1388_s6 + $0x4] sm:$0xf] (%p360_p0), %vm333_vm3, %v573_v59  ;;  %v581_v6 = vld [vmem:[#allocation4 + $0x24] sm:$0xf] (%p360_p0)  ;;  %v583_v7 = vld [vmem:[#allocation4 + $0x2c] sm:$0xf] (%p360_p0) }
 0x32a   :  { %593 = vst.msk [vmem:[%s1388_s6 + $0x14] sm:$0xf] (%p360_p0), %vm333_vm3, %v577_v61  ;;  %v582_v10 = vld [vmem:[#allocation4 + $0x28] sm:$0xf] (%p360_p0)  ;;  %v584_v60 = vld [vmem:[#allocation4 + $0x30] sm:$0xf] (%p360_p0) }
 0x32b   :  { %591 = vst.msk [vmem:[%s1388_s6 + $0xc] sm:$0xf] (%p360_p0), %vm333_vm3, %v575_v62  ;;  %v585_v13 = vld [vmem:[#allocation4 + $0x34] sm:$0xf] (%p360_p0)  ;;  %v587_v17 = vld [vmem:[#allocation4 + $0x3c] sm:$0xf] (%p360_p0) }
 0x32c   :  { %594 = vst.msk [vmem:[%s1388_s6 + $0x18] sm:$0xf] (%p360_p0), %vm333_vm3, %v578_v1 }
 0x32d   :  { %596 = vst.msk [vmem:[%s1388_s6 + $0x20] sm:$0xf] (%p360_p0), %vm333_vm3, %v580_v2 }
 0x32e   :  { %595 = vst.msk [vmem:[%s1388_s6 + $0x1c] sm:$0xf] (%p360_p0), %vm333_vm3, %v579_v3 }
 0x32f   : > { %v561_v47 = vpop.permute.xlu2 %560  ;;  %597 = vst.msk [vmem:[%s1388_s6 + $0x24] sm:$0xf] (%p360_p0), %vm333_vm3, %v581_v6 }
 0x330   : > { %v563_v48 = vmul.f32 %v561_v47, %v1211_v27  ;;  %599 = vst.msk [vmem:[%s1388_s6 + $0x2c] sm:$0xf] (%p360_p0), %vm333_vm3, %v583_v7 }
 0x331   :  { %598 = vst.msk [vmem:[%s1388_s6 + $0x28] sm:$0xf] (%p360_p0), %vm333_vm3, %v582_v10 }
 0x332   : > { %v565_v14 = vadd.f32 %v1220_v32, %v563_v48   ;;  %600 = vst.msk [vmem:[%s1388_s6 + $0x30] sm:$0xf] (%p360_p0), %vm333_vm3, %v584_v60 }
 0x333   :  { %601 = vst.msk [vmem:[%s1388_s6 + $0x34] sm:$0xf] (%p360_p0), %vm333_vm3, %v585_v13 }
 0x334   :  { %603 = vst.msk [vmem:[%s1388_s6 + $0x3c] sm:$0xf] (%p360_p0), %vm333_vm3, %v587_v17 }
 0x337   : > { %v542_v49 = vpop.permute.xlu1 %541 }
 0x338   : > { %v544_v50 = vmul.f32 %v542_v49, %v1206_v23 }
 0x33a   : > { %v546_v16 = vadd.f32 %v1216_v30, %v544_v50  }
 0x33f   : > { %v551_v51 = vpop.permute.xlu0 %550 }
 0x340   : > { %v553_v52 = vmul.f32 %v551_v51, %v1211_v27 }
 0x342   : > { %v556_v44 = vadd.f32 %v1218_v31, %v553_v52   ;;  %362 = sbr.rel (!%p360_p0) target bundleno = 191 (0xbf), region = 64 }
 0x344   : > { %v569_v29 = vmul.f32 %v556_v44, %v1211_v27  ;;  %v586_v44 = vld [vmem:[#allocation4 + $0x38] sm:$0xf] (%p360_p0) }
 0x345   :  { %602 = vst.msk [vmem:[%s1388_s6 + $0x38] sm:$0xf] (%p360_p0), %vm333_vm3, %v586_v44 }
 0x346   : > { %571 = vst.msk [vmem:[%s570_s5] sm:$0xf] %vm333_vm3, %v569_v29 }
 0x34d   :  { %v604_v23 = vld [vmem:[#allocation5] sm:$0xf]  ;;  %v606_v30 = vld [vmem:[#allocation5 + $0x8] sm:$0xf]  ;;  %v608_v27 = vld [vmem:[#allocation5 + $0x10] sm:$0xf] }
 0x34e   :  { %636 = vrot.lane.b32.xlu0 %v604_v23, %s922_s21  ;;  %640 = vrot.lane.b32.xlu1 %v606_v30, %s922_s21  ;;  %v605_v31 = vld [vmem:[#allocation5 + $0x4] sm:$0xf]  ;;  %v607_v32 = vld [vmem:[#allocation5 + $0xc] sm:$0xf]  ;;  %v609_v53 = vld [vmem:[#allocation5 + $0x14] sm:$0xf] }
 0x34f   :  { %644 = vrot.lane.b32.xlu2 %v608_v27, %s922_s21  ;;  %v610_v54 = vld [vmem:[#allocation5 + $0x18] sm:$0xf]  ;;  %v611_v55 = vld [vmem:[#allocation5 + $0x1c] sm:$0xf]  ;;  %v612_v56 = vld [vmem:[#allocation5 + $0x20] sm:$0xf] }
 0x350   :  { %v613_v57 = vld [vmem:[#allocation5 + $0x24] sm:$0xf]  ;;  %v614_v0 = vld [vmem:[#allocation5 + $0x28] sm:$0xf]  ;;  %v615_v5 = vld [vmem:[#allocation5 + $0x2c] sm:$0xf] }
 0x351   :  { %v616_v8 = vld [vmem:[#allocation5 + $0x30] sm:$0xf]  ;;  %v617_v9 = vld [vmem:[#allocation5 + $0x34] sm:$0xf]  ;;  %v618_v11 = vld [vmem:[#allocation5 + $0x38] sm:$0xf] }
 0x352   :  { %v619_v15 = vld [vmem:[#allocation5 + $0x3c] sm:$0xf] }
 0x356   :  { %638 = vrot.lane.b32.xlu0 %v605_v31, %s922_s21  ;;  %642 = vrot.lane.b32.xlu1 %v607_v32, %s922_s21 }
 0x357   :  { %646 = vrot.lane.b32.xlu2 %v609_v53, %s922_s21 }
 0x35e   :  { %648 = vrot.lane.b32.xlu0 %v610_v54, %s922_s21  ;;  %650 = vrot.lane.b32.xlu1 %v611_v55, %s922_s21 }
 0x35f   :  { %652 = vrot.lane.b32.xlu2 %v612_v56, %s922_s21 }
 0x366   :  { %654 = vrot.lane.b32.xlu0 %v613_v57, %s922_s21  ;;  %656 = vrot.lane.b32.xlu1 %v614_v0, %s922_s21 }
 0x367   :  { %658 = vrot.lane.b32.xlu2 %v615_v5, %s922_s21 }
 0x36e   :  { %660 = vrot.lane.b32.xlu0 %v616_v8, %s922_s21  ;;  %662 = vrot.lane.b32.xlu1 %v617_v9, %s922_s21 }
 0x36f   :  { %664 = vrot.lane.b32.xlu2 %v618_v11, %s922_s21 }
 0x376   :  { %666 = vrot.lane.b32.xlu0 %v619_v15, %s922_s21 }
 0x3a9   :  { %v645_v63 = vpop.permute.xlu2 %644 }
 0x3aa   :  { %689 = vst.msk [vmem:[%s1388_s6 + $0x10] sm:$0xf] %vm684_vm0, %v645_v63 }
 0x3b1   :  { %v647_v4 = vpop.permute.xlu2 %646 }
 0x3b2   :  { %690 = vst.msk [vmem:[%s1388_s6 + $0x14] sm:$0xf] %vm684_vm0, %v647_v4 }
 0x3b9   :  { %v653_v43 = vpop.permute.xlu2 %652 }
 0x3ba   :  { %693 = vst.msk [vmem:[%s1388_s6 + $0x20] sm:$0xf] %vm684_vm0, %v653_v43 }
 0x3c0   :  { %v637_v12 = vpop.permute.xlu0 %636  ;;  %v641_v14 = vpop.permute.xlu1 %640 }
 0x3c1   :  { %685 = vst.msk [vmem:[%s1388_s6] sm:$0xf] %vm684_vm0, %v637_v12  ;;  %v659_v16 = vpop.permute.xlu2 %658 }
 0x3c2   :  { %687 = vst.msk [vmem:[%s1388_s6 + $0x8] sm:$0xf] %vm684_vm0, %v641_v14 }
 0x3c3   :  { %696 = vst.msk [vmem:[%s1388_s6 + $0x2c] sm:$0xf] %vm684_vm0, %v659_v16 }
 0x3c8   :  { %v639_v19 = vpop.permute.xlu0 %638  ;;  %v643_v20 = vpop.permute.xlu1 %642 }
 0x3c9   :  { %686 = vst.msk [vmem:[%s1388_s6 + $0x4] sm:$0xf] %vm684_vm0, %v639_v19  ;;  %v665_v21 = vpop.permute.xlu2 %664 }
 0x3ca   :  { %688 = vst.msk [vmem:[%s1388_s6 + $0xc] sm:$0xf] %vm684_vm0, %v643_v20 }
 0x3cb   :  { %699 = vst.msk [vmem:[%s1388_s6 + $0x38] sm:$0xf] %vm684_vm0, %v665_v21 }
 0x3d0   :  { %v649_v24 = vpop.permute.xlu0 %648  ;;  %v651_v25 = vpop.permute.xlu1 %650 }
 0x3d1   :  { %691 = vst.msk [vmem:[%s1388_s6 + $0x18] sm:$0xf] %vm684_vm0, %v649_v24 }
 0x3d2   :  { %692 = vst.msk [vmem:[%s1388_s6 + $0x1c] sm:$0xf] %vm684_vm0, %v651_v25 }
 0x3d8   :  { %v655_v26 = vpop.permute.xlu0 %654  ;;  %v657_v28 = vpop.permute.xlu1 %656 }
 0x3d9   :  { %694 = vst.msk [vmem:[%s1388_s6 + $0x24] sm:$0xf] %vm684_vm0, %v655_v26 }
 0x3da   :  { %695 = vst.msk [vmem:[%s1388_s6 + $0x28] sm:$0xf] %vm684_vm0, %v657_v28 }
 0x3e0   :  { %v661_v33 = vpop.permute.xlu0 %660  ;;  %v663_v34 = vpop.permute.xlu1 %662 }
 0x3e1   :  { %697 = vst.msk [vmem:[%s1388_s6 + $0x30] sm:$0xf] %vm684_vm0, %v661_v33 }
 0x3e2   :  { %698 = vst.msk [vmem:[%s1388_s6 + $0x34] sm:$0xf] %vm684_vm0, %v663_v34 }
 0x3e8   :  { %v667_v35 = vpop.permute.xlu0 %666 }
 0x3e9   :  { %700 = vst.msk [vmem:[%s1388_s6 + $0x3c] sm:$0xf] %vm684_vm0, %v667_v35 }

</bundles_post_ra>
